<compile_context>
chip_gen: v6e
topology: v6e:2x2x1
jax: 0.10.0
libtpu: 0.0.40
codegen_flags: <defaults>
</compile_context>

<pallas_src>
import functools

import jax
import jax.numpy as jnp
from jax.experimental import pallas as pl
from jax.experimental.pallas import tpu as pltpu

_LANE = 128


def _round_up(x, m):
    return (x + m - 1) // m * m


def _tpu_generation():
    """Best-effort TPU generation from device_kind; 0 if unknown."""
    try:
        kind = jax.devices()[0].device_kind.lower()
    except Exception:
        return 0
    for g in (7, 6, 5, 4, 3, 2):
        if f"v{g}" in kind:
            return g
    return 0


def _vmem_capacity_bytes():
    """Per-core VMEM capacity; conservative 64 MiB (v7x) if the query fails."""
    try:
        return int(pltpu.get_tpu_info().vmem_capacity_bytes)
    except Exception:
        return 64 << 20


def _qrot_mlp_kernel(x_ref, y_ref,
                     wfc_ref, wfc2_ref, wproj_ref,
                     bfc_ref, bfc2_ref, bproj_ref,
                     o_ref, acc_ref, *, eps, ew_dtype):
    """One (tm, n_pad) row tile x one tk-wide hidden-quaternion tile."""
    k = pl.program_id(1)

    @pl.when(k == 0)
    def _init():
        acc_ref[...] = jnp.zeros_like(acc_ref)

    mxu_dt = wfc_ref.dtype
    # In-kernel cast of activations to the MXU dtype (no-op if already bf16).
    xin = x_ref[...].astype(mxu_dt)
    yin = y_ref[...].astype(mxu_dt)

    def mm(a, w):
        return jnp.dot(a, w, preferred_element_type=jnp.float32)

    # c_fc2: one MXU dot per quaternion component (weights were de-interleaved
    # and split per component at prep time), f32 accumulation + f32 bias.
    yw = mm(yin, wfc2_ref[0]) + bfc2_ref[0]
    yx = mm(yin, wfc2_ref[1]) + bfc2_ref[1]
    yy = mm(yin, wfc2_ref[2]) + bfc2_ref[2]
    yz = mm(yin, wfc2_ref[3]) + bfc2_ref[3]

    # ynorm=True: sum-of-squares + rsqrt (EUP) in f32 (eps keeps padded
    # all-zero quaternions finite); normalization multiplies and the Hamilton
    # product run in ew_dtype (bf16 on v6e/v7x, f32 on v5e / f32-weight path).
    inv = jax.lax.rsqrt(yw * yw + yx * yx + yy * yy + yz * yz + eps)
    inv = inv.astype(ew_dtype)
    yw = yw.astype(ew_dtype) * inv
    yx = yx.astype(ew_dtype) * inv
    yy = yy.astype(ew_dtype) * inv
    yz = yz.astype(ew_dtype) * inv

    # c_fc (xnorm=False: rotors used unnormalized).
    xw = (mm(xin, wfc_ref[0]) + bfc_ref[0]).astype(ew_dtype)
    xx = (mm(xin, wfc_ref[1]) + bfc_ref[1]).astype(ew_dtype)
    xy = (mm(xin, wfc_ref[2]) + bfc_ref[2]).astype(ew_dtype)
    xz = (mm(xin, wfc_ref[3]) + bfc_ref[3]).astype(ew_dtype)

    # Hamilton product rotors(x) * rotated(y), component order (w, x, y, z).
    rw = xw * yw - xx * yx - xy * yy - xz * yz
    rx = xw * yx + xx * yw + xy * yz - xz * yy
    ry = xw * yy - xx * yz + xy * yw + xz * yx
    rz = xw * yz + xx * yy - xy * yx + xz * yw

    # c_proj: four per-component dots accumulate into the f32 scratch.
    # TODO(synk): on v6e/v7x with n_pad <= 256, fuse the 4 fc dots (and the 4
    # c_proj dots) into single 4*n_pad-wide MXU dots to fill the 256-wide MXU.
    acc_ref[...] += (mm(rw.astype(mxu_dt), wproj_ref[0]) +
                     mm(rx.astype(mxu_dt), wproj_ref[1]) +
                     mm(ry.astype(mxu_dt), wproj_ref[2]) +
                     mm(rz.astype(mxu_dt), wproj_ref[3]))

    @pl.when(k == pl.num_programs(1) - 1)
    def _finish():
        # dropout(p=0.0) -> identity.
        # TODO(synk): training-mode dropout (p > 0) not implemented (eval only).
        o_ref[...] = (acc_ref[...] + bproj_ref[...]).astype(o_ref.dtype)


def prepare_qrot_mlp_params(params, *, mxu_dtype=jnp.bfloat16):
    """One-time weight prep: de-interleave quaternion components, split into
    per-component (n, n) blocks, pad n up to a lane multiple (128) and cast the
    MXU operands.  Call once at load time, NOT per forward pass."""
    w_fc, b_fc, w_fc2, b_fc2, w_proj, b_proj = params
    n = w_fc.shape[1]
    n_pad = _round_up(n, _LANE)
    dn = n_pad - n

    def split_fc(w, b):
        # Block c is used as  x @ block_c  -> hidden columns c::4 (component c).
        wb = jnp.stack([w[c::4, :].T for c in range(4)], axis=0)        # (4, n, n)
        bb = jnp.stack([b[c::4] for c in range(4)], axis=0)             # (4, n)
        wb = jnp.pad(wb, ((0, 0), (0, dn), (0, dn))).astype(mxu_dtype)
        bb = jnp.pad(bb, ((0, 0), (0, dn))).reshape(4, 1, n_pad).astype(jnp.float32)
        return wb, bb

    wfc, bfc = split_fc(w_fc, b_fc)
    wfc2, bfc2 = split_fc(w_fc2, b_fc2)

    # Block c is used as  r_c @ block_c  (rows c::4 of W_proj.T).
    wproj = jnp.stack([w_proj[:, c::4].T for c in range(4)], axis=0)    # (4, n, n)
    wproj = jnp.pad(wproj, ((0, 0), (0, dn), (0, dn))).astype(mxu_dtype)
    bproj = jnp.pad(b_proj, (0, dn)).reshape(1, n_pad).astype(jnp.float32)

    return dict(wfc=wfc, bfc=bfc, wfc2=wfc2, bfc2=bfc2, wproj=wproj, bproj=bproj)


def qrot_mlp_forward(x, y, prep, *, tm=512, eps=1e-12):
    """x, y: (B, T, n_embd) float32 or bfloat16; prep from
    prepare_qrot_mlp_params.  Returns (B, T, n_embd) in x.dtype."""
    B, T, n = x.shape
    M = B * T
    n_pad = prep["wproj"].shape[-1]
    w_itemsize = jnp.dtype(prep["wfc"].dtype).itemsize
    act_itemsize = jnp.dtype(x.dtype).itemsize

    # ---- row tiling: multiple of 8; aim for >= 2 grid steps (v7x has 2 TCs,
    # the extra step costs ~0.35us on 1-TC chips) but never below 64 rows.
    tm = _round_up(tm, 8)
    tm = min(tm, max(_round_up(-(-M // 2), 8), 64))
    tm = min(tm, _round_up(M, 8))
    grid_m = pl.cdiv(M, tm)

    # ---- VMEM budget from the real chip capacity.
    vmem_cap = max(_vmem_capacity_bytes(), 32 << 20)
    w_budget = max((vmem_cap - (8 << 20)) // 2, 8 << 20)

    # ---- hidden-quaternion tiling: resident weights when they fit, else
    # stream column/row tiles along a second "arbitrary" grid axis.
    q = n_pad // _LANE
    grid_k = q
    for d in range(1, q + 1):
        if q % d:
            continue
        bufs = 1 if d == 1 else 2      # resident -> single buffer, streamed -> 2
        if 3 * 4 * n_pad * (n_pad // d) * w_itemsize * bufs <= w_budget:
            grid_k = d
            break
    tk = n_pad // grid_k
    resident = grid_k == 1

    # ---- elementwise dtype: bf16 only where the VPU supports it natively.
    gen = _tpu_generation()
    use_bf16_ew = (jnp.dtype(prep["wfc"].dtype) == jnp.dtype(jnp.bfloat16)) and gen >= 6
    ew_dtype = jnp.bfloat16 if use_bf16_ew else jnp.float32

    # ---- lane padding only (rows stay ragged; Pallas masks the last block).
    x2 = x.reshape(M, n)
    y2 = y.reshape(M, n)
    if n_pad != n:
        x2 = jnp.pad(x2, ((0, 0), (0, n_pad - n)))
        y2 = jnp.pad(y2, ((0, 0), (0, n_pad - n)))

    # ---- VMEM limit from the real footprint, capped by chip capacity - 8 MiB.
    w_bufs = 1 if resident else 2
    need = (3 * 4 * n_pad * tk * w_itemsize * w_bufs       # weight tiles
            + (2 * 4 * tk + n_pad) * 4 * 2                 # biases
            + 2 * tm * n_pad * act_itemsize * 2            # x, y tiles (double-buf)
            + tm * n_pad * act_itemsize * 2                # out tile
            + tm * n_pad * 4                               # f32 accumulator scratch
            + 16 * tm * tk * 4                             # elementwise temporaries
            + (4 << 20))                                   # slack
    vmem_limit = int(min(max(need, 32 << 20), vmem_cap - (8 << 20)))

    cost = pl.CostEstimate(
        flops=24 * M * n_pad * n_pad,
        transcendentals=M * n_pad,
        bytes_accessed=int(3 * M * n * act_itemsize
                           + 3 * 4 * n_pad * n_pad * w_itemsize
                           + 9 * n_pad * 4))

    # ---- BlockSpecs.
    row_spec = pl.BlockSpec((tm, n_pad), lambda m, k: (m, 0))
    if resident:
        wfc_spec = pl.BlockSpec((4, n_pad, tk), lambda m, k: (0, 0, 0),
                                pipeline_mode=pl.Buffered(1))
        wproj_spec = pl.BlockSpec((4, tk, n_pad), lambda m, k: (0, 0, 0),
                                  pipeline_mode=pl.Buffered(1))
        bfc_spec = pl.BlockSpec((4, 1, tk), lambda m, k: (0, 0, 0),
                                pipeline_mode=pl.Buffered(1))
    else:
        wfc_spec = pl.BlockSpec((4, n_pad, tk), lambda m, k: (0, 0, k))
        wproj_spec = pl.BlockSpec((4, tk, n_pad), lambda m, k: (0, k, 0))
        bfc_spec = pl.BlockSpec((4, 1, tk), lambda m, k: (0, 0, k))
    bproj_spec = pl.BlockSpec((1, n_pad), lambda m, k: (0, 0),
                              pipeline_mode=pl.Buffered(1))

    kernel = functools.partial(_qrot_mlp_kernel, eps=eps, ew_dtype=ew_dtype)

    out2 = pl.pallas_call(
        kernel,
        out_shape=jax.ShapeDtypeStruct((M, n_pad), x.dtype),
        grid_spec=pltpu.PrefetchScalarGridSpec(
            num_scalar_prefetch=0,
            grid=(grid_m, grid_k),
            in_specs=[
                row_spec,        # x rows
                row_spec,        # y rows
                wfc_spec,        # W_fc   (4, n_pad, n_pad) -> (4, n_pad, tk)
                wfc_spec,        # W_fc2
                wproj_spec,      # W_proj (4, n_pad, n_pad) -> (4, tk, n_pad)
                bfc_spec,        # b_fc   (4, 1, n_pad) -> (4, 1, tk)
                bfc_spec,        # b_fc2
                bproj_spec,      # b_proj (1, n_pad)
            ],
            out_specs=row_spec,
            scratch_shapes=[pltpu.VMEM((tm, n_pad), jnp.float32)]),
        compiler_params=pltpu.CompilerParams(
            dimension_semantics=("parallel", "arbitrary"),
            vmem_limit_bytes=vmem_limit),
        cost_estimate=cost,
    )(x2, y2, prep["wfc"], prep["wfc2"], prep["wproj"],
      prep["bfc"], prep["bfc2"], prep["bproj"])

    if n_pad != n:
        out2 = out2[:, :n]
    return out2.reshape(B, T, n)


def qrot_mlp_reference(x, y, params):
    """Pure-JAX reference mirroring the PyTorch module (interleaved layout)."""
    B, T, n = x.shape
    w_fc, b_fc, w_fc2, b_fc2, w_proj, b_proj = params
    hx = x @ w_fc.T + b_fc          # (B, T, 4n)
    hy = y @ w_fc2.T + b_fc2        # (B, T, 4n)
    x4 = hx.reshape(B, T, n, 4)     # xnorm=False
    y4 = hy.reshape(B, T, n, 4)
    y4 = y4 / jnp.linalg.norm(y4, axis=-1, keepdims=True)  # ynorm=True
    xw, xx, xy, xz = x4[..., 0], x4[..., 1], x4[..., 2], x4[..., 3]
    yw, yx, yy, yz = y4[..., 0], y4[..., 1], y4[..., 2], y4[..., 3]
    rw = xw * yw - xx * yx - xy * yy - xz * yz
    rx = xw * yx + xx * yw + xy * yz - xz * yy
    ry = xw * yy - xx * yz + xy * yw + xz * yx
    rz = xw * yz + xx * yy - xy * yx + xz * yw
    r = jnp.stack([rw, rx, ry, rz], axis=-1).reshape(B, T, 4 * n)
    return r @ w_proj.T + b_proj


def init_params(key, n_embd):
    """Deterministic PyTorch-default-style init (uniform +-1/sqrt(fan_in))."""
    h = 4 * n_embd
    ks = jax.random.split(key, 6)
    bnd_fc = 1.0 / jnp.sqrt(n_embd)
    bnd_pr = 1.0 / jnp.sqrt(h)
    w_fc = jax.random.uniform(ks[0], (h, n_embd), jnp.float32, -bnd_fc, bnd_fc)
    b_fc = jax.random.uniform(ks[1], (h,), jnp.float32, -bnd_fc, bnd_fc)
    w_fc2 = jax.random.uniform(ks[2], (h, n_embd), jnp.float32, -bnd_fc, bnd_fc)
    b_fc2 = jax.random.uniform(ks[3], (h,), jnp.float32, -bnd_fc, bnd_fc)
    w_proj = jax.random.uniform(ks[4], (n_embd, h), jnp.float32, -bnd_pr, bnd_pr)
    b_proj = jax.random.uniform(ks[5], (n_embd,), jnp.float32, -bnd_pr, bnd_pr)
    return (w_fc, b_fc, w_fc2, b_fc2, w_proj, b_proj)


if __name__ == "__main__":
    B, T, N_EMBD = 2, 8, 32
    key = jax.random.PRNGKey(0)
    kx, ky, kp = jax.random.split(key, 3)
    x = jax.random.normal(kx, (B, T, N_EMBD), jnp.float32)
    y = jax.random.normal(ky, (B, T, N_EMBD), jnp.float32)
    params = init_params(kp, N_EMBD)
    ref = qrot_mlp_reference(x, y, params)

    fwd = jax.jit(qrot_mlp_forward, static_argnames=("tm", "eps"))

    # f32-weight path: compare against the pure-JAX reference.  Tolerance
    # allows for the TPU's default reduced-precision f32 matmul passes.
    prep_f32 = prepare_qrot_mlp_params(params, mxu_dtype=jnp.float32)
    out_f32 = jax.block_until_ready(fwd(x, y, prep_f32))
    assert out_f32.shape == (B, T, N_EMBD)
    assert bool(jnp.allclose(out_f32, ref, atol=3e-2, rtol=3e-2)), (
        float(jnp.max(jnp.abs(out_f32 - ref))))

    # bf16 MXU path (default fast path): f32 accumulation keeps the error at
    # input-rounding level; loose tolerance vs. the f32 reference.
    prep_bf16 = prepare_qrot_mlp_params(params, mxu_dtype=jnp.bfloat16)
    out_bf16 = jax.block_until_ready(fwd(x, y, prep_bf16))
    assert out_bf16.shape == (B, T, N_EMBD)
    assert bool(jnp.allclose(out_bf16, ref, atol=1.5e-1, rtol=1.5e-1)), (
        float(jnp.max(jnp.abs(out_bf16 - ref))))

    print("KERNEL_OK")
</pallas_src>

<mosaic_0001>
module attributes {stable_mosaic.version = 11 : i64} {
  func.func @_qrot_mlp_kernel(%arg0: i32, %arg1: i32, %arg2: memref<16x128xf32, #tpu.memory_space<vmem>>, %arg3: memref<16x128xf32, #tpu.memory_space<vmem>>, %arg4: memref<4x128x128xf32, #tpu.memory_space<vmem>>, %arg5: memref<4x128x128xf32, #tpu.memory_space<vmem>>, %arg6: memref<4x128x128xf32, #tpu.memory_space<vmem>>, %arg7: memref<4x1x128xf32, #tpu.memory_space<vmem>>, %arg8: memref<4x1x128xf32, #tpu.memory_space<vmem>>, %arg9: memref<1x128xf32, #tpu.memory_space<vmem>>, %arg10: memref<16x128xf32, #tpu.memory_space<vmem>>, %arg11: memref<16x128xf32, #tpu.memory_space<vmem>>) attributes {dimension_semantics = [#tpu.dimension_semantics<parallel>, #tpu.dimension_semantics<arbitrary>], iteration_bounds = array<i64: 1, 1>, scalar_prefetch = 0 : i64, scratch_operands = 1 : i64, tpu.core_type = #tpu.core_type<tc>, window_params = [{transform_indices = @transform_0, window_bounds = array<i64: 16, 128>}, {transform_indices = @transform_1, window_bounds = array<i64: 16, 128>}, {pipeline_mode = #tpu.pipeline_mode<synchronous>, transform_indices = @transform_2, window_bounds = array<i64: 4, 128, 128>}, {pipeline_mode = #tpu.pipeline_mode<synchronous>, transform_indices = @transform_3, window_bounds = array<i64: 4, 128, 128>}, {pipeline_mode = #tpu.pipeline_mode<synchronous>, transform_indices = @transform_4, window_bounds = array<i64: 4, 128, 128>}, {pipeline_mode = #tpu.pipeline_mode<synchronous>, transform_indices = @transform_5, window_bounds = array<i64: 4, 1, 128>}, {pipeline_mode = #tpu.pipeline_mode<synchronous>, transform_indices = @transform_6, window_bounds = array<i64: 4, 1, 128>}, {pipeline_mode = #tpu.pipeline_mode<synchronous>, transform_indices = @transform_7, window_bounds = array<i64: 1, 128>}, {transform_indices = @transform_8, window_bounds = array<i64: 16, 128>}]} {
    %c0_i32 = arith.constant 0 : i32
    %0 = arith.cmpi eq, %arg1, %c0_i32 : i32
    %1 = arith.extui %0 : i1 to i32
    %c0_i32_0 = arith.constant 0 : i32
    %2 = arith.cmpi ne, %1, %c0_i32_0 : i32
    scf.if %2 {
      %cst_79 = arith.constant 0.000000e+00 : f32
      %124 = vector.broadcast %cst_79 : f32 to vector<16x128xf32>
      %c0_80 = arith.constant 0 : index
      %c0_81 = arith.constant 0 : index
      %125 = vector.load %arg11[%c0_80, %c0_81] : memref<16x128xf32, #tpu.memory_space<vmem>>, vector<16x128xf32>
      tpu.vector_store %arg11[%c0_80, %c0_81], %124 {strides = array<i32>} : memref<16x128xf32, #tpu.memory_space<vmem>>, vector<16x128xf32>,
    } else {
    }
    %c0 = arith.constant 0 : index
    %c0_1 = arith.constant 0 : index
    %3 = vector.load %arg2[%c0, %c0_1] : memref<16x128xf32, #tpu.memory_space<vmem>>, vector<16x128xf32>
    %c0_2 = arith.constant 0 : index
    %c0_3 = arith.constant 0 : index
    %4 = vector.load %arg3[%c0_2, %c0_3] : memref<16x128xf32, #tpu.memory_space<vmem>>, vector<16x128xf32>
    %c0_4 = arith.constant 0 : index
    %c0_5 = arith.constant 0 : index
    %c0_6 = arith.constant 0 : index
    %5 = vector.load %arg5[%c0_4, %c0_5, %c0_6] : memref<4x128x128xf32, #tpu.memory_space<vmem>>, vector<1x128x128xf32>
    %6 = vector.shape_cast %5 : vector<1x128x128xf32> to vector<128x128xf32>
    %cst = arith.constant dense<0.000000e+00> : vector<16x128xf32>
    %7 = tpu.matmul %4, %6, %cst {dimension_numbers = #tpu.dot_dimension_numbers<[1], [0], [0], [1], [0, 0, 1, 1], [], []>} : vector<16x128xf32>, vector<128x128xf32>, vector<16x128xf32> -> vector<16x128xf32>
    %c0_7 = arith.constant 0 : index
    %c0_8 = arith.constant 0 : index
    %c0_9 = arith.constant 0 : index
    %8 = vector.load %arg8[%c0_7, %c0_8, %c0_9] : memref<4x1x128xf32, #tpu.memory_space<vmem>>, vector<1x1x128xf32>
    %9 = vector.shape_cast %8 : vector<1x1x128xf32> to vector<1x128xf32>
    %10 = vector.broadcast %9 : vector<1x128xf32> to vector<16x128xf32>
    %11 = arith.addf %7, %10 : vector<16x128xf32>
    %c1 = arith.constant 1 : index
    %c0_10 = arith.constant 0 : index
    %c0_11 = arith.constant 0 : index
    %12 = vector.load %arg5[%c1, %c0_10, %c0_11] : memref<4x128x128xf32, #tpu.memory_space<vmem>>, vector<1x128x128xf32>
    %13 = vector.shape_cast %12 : vector<1x128x128xf32> to vector<128x128xf32>
    %cst_12 = arith.constant dense<0.000000e+00> : vector<16x128xf32>
    %14 = tpu.matmul %4, %13, %cst_12 {dimension_numbers = #tpu.dot_dimension_numbers<[1], [0], [0], [1], [0, 0, 1, 1], [], []>} : vector<16x128xf32>, vector<128x128xf32>, vector<16x128xf32> -> vector<16x128xf32>
    %c1_13 = arith.constant 1 : index
    %c0_14 = arith.constant 0 : index
    %c0_15 = arith.constant 0 : index
    %15 = vector.load %arg8[%c1_13, %c0_14, %c0_15] : memref<4x1x128xf32, #tpu.memory_space<vmem>>, vector<1x1x128xf32>
    %16 = vector.shape_cast %15 : vector<1x1x128xf32> to vector<1x128xf32>
    %17 = vector.broadcast %16 : vector<1x128xf32> to vector<16x128xf32>
    %18 = arith.addf %14, %17 : vector<16x128xf32>
    %c2 = arith.constant 2 : index
    %c0_16 = arith.constant 0 : index
    %c0_17 = arith.constant 0 : index
    %19 = vector.load %arg5[%c2, %c0_16, %c0_17] : memref<4x128x128xf32, #tpu.memory_space<vmem>>, vector<1x128x128xf32>
    %20 = vector.shape_cast %19 : vector<1x128x128xf32> to vector<128x128xf32>
    %cst_18 = arith.constant dense<0.000000e+00> : vector<16x128xf32>
    %21 = tpu.matmul %4, %20, %cst_18 {dimension_numbers = #tpu.dot_dimension_numbers<[1], [0], [0], [1], [0, 0, 1, 1], [], []>} : vector<16x128xf32>, vector<128x128xf32>, vector<16x128xf32> -> vector<16x128xf32>
    %c2_19 = arith.constant 2 : index
    %c0_20 = arith.constant 0 : index
    %c0_21 = arith.constant 0 : index
    %22 = vector.load %arg8[%c2_19, %c0_20, %c0_21] : memref<4x1x128xf32, #tpu.memory_space<vmem>>, vector<1x1x128xf32>
    %23 = vector.shape_cast %22 : vector<1x1x128xf32> to vector<1x128xf32>
    %24 = vector.broadcast %23 : vector<1x128xf32> to vector<16x128xf32>
    %25 = arith.addf %21, %24 : vector<16x128xf32>
    %c3 = arith.constant 3 : index
    %c0_22 = arith.constant 0 : index
    %c0_23 = arith.constant 0 : index
    %26 = vector.load %arg5[%c3, %c0_22, %c0_23] : memref<4x128x128xf32, #tpu.memory_space<vmem>>, vector<1x128x128xf32>
    %27 = vector.shape_cast %26 : vector<1x128x128xf32> to vector<128x128xf32>
    %cst_24 = arith.constant dense<0.000000e+00> : vector<16x128xf32>
    %28 = tpu.matmul %4, %27, %cst_24 {dimension_numbers = #tpu.dot_dimension_numbers<[1], [0], [0], [1], [0, 0, 1, 1], [], []>} : vector<16x128xf32>, vector<128x128xf32>, vector<16x128xf32> -> vector<16x128xf32>
    %c3_25 = arith.constant 3 : index
    %c0_26 = arith.constant 0 : index
    %c0_27 = arith.constant 0 : index
    %29 = vector.load %arg8[%c3_25, %c0_26, %c0_27] : memref<4x1x128xf32, #tpu.memory_space<vmem>>, vector<1x1x128xf32>
    %30 = vector.shape_cast %29 : vector<1x1x128xf32> to vector<1x128xf32>
    %31 = vector.broadcast %30 : vector<1x128xf32> to vector<16x128xf32>
    %32 = arith.addf %28, %31 : vector<16x128xf32>
    %33 = arith.mulf %11, %11 : vector<16x128xf32>
    %34 = arith.mulf %18, %18 : vector<16x128xf32>
    %35 = arith.addf %33, %34 : vector<16x128xf32>
    %36 = arith.mulf %25, %25 : vector<16x128xf32>
    %37 = arith.addf %35, %36 : vector<16x128xf32>
    %38 = arith.mulf %32, %32 : vector<16x128xf32>
    %39 = arith.addf %37, %38 : vector<16x128xf32>
    %cst_28 = arith.constant 9.99999996E-13 : f32
    %40 = vector.broadcast %cst_28 : f32 to vector<16x128xf32>
    %41 = arith.addf %39, %40 : vector<16x128xf32>
    %42 = math.rsqrt %41 : vector<16x128xf32>
    %43 = arith.mulf %11, %42 : vector<16x128xf32>
    %44 = arith.mulf %18, %42 : vector<16x128xf32>
    %45 = arith.mulf %25, %42 : vector<16x128xf32>
    %46 = arith.mulf %32, %42 : vector<16x128xf32>
    %c0_29 = arith.constant 0 : index
    %c0_30 = arith.constant 0 : index
    %c0_31 = arith.constant 0 : index
    %47 = vector.load %arg4[%c0_29, %c0_30, %c0_31] : memref<4x128x128xf32, #tpu.memory_space<vmem>>, vector<1x128x128xf32>
    %48 = vector.shape_cast %47 : vector<1x128x128xf32> to vector<128x128xf32>
    %cst_32 = arith.constant dense<0.000000e+00> : vector<16x128xf32>
    %49 = tpu.matmul %3, %48, %cst_32 {dimension_numbers = #tpu.dot_dimension_numbers<[1], [0], [0], [1], [0, 0, 1, 1], [], []>} : vector<16x128xf32>, vector<128x128xf32>, vector<16x128xf32> -> vector<16x128xf32>
    %c0_33 = arith.constant 0 : index
    %c0_34 = arith.constant 0 : index
    %c0_35 = arith.constant 0 : index
    %50 = vector.load %arg7[%c0_33, %c0_34, %c0_35] : memref<4x1x128xf32, #tpu.memory_space<vmem>>, vector<1x1x128xf32>
    %51 = vector.shape_cast %50 : vector<1x1x128xf32> to vector<1x128xf32>
    %52 = vector.broadcast %51 : vector<1x128xf32> to vector<16x128xf32>
    %53 = arith.addf %49, %52 : vector<16x128xf32>
    %c1_36 = arith.constant 1 : index
    %c0_37 = arith.constant 0 : index
    %c0_38 = arith.constant 0 : index
    %54 = vector.load %arg4[%c1_36, %c0_37, %c0_38] : memref<4x128x128xf32, #tpu.memory_space<vmem>>, vector<1x128x128xf32>
    %55 = vector.shape_cast %54 : vector<1x128x128xf32> to vector<128x128xf32>
    %cst_39 = arith.constant dense<0.000000e+00> : vector<16x128xf32>
    %56 = tpu.matmul %3, %55, %cst_39 {dimension_numbers = #tpu.dot_dimension_numbers<[1], [0], [0], [1], [0, 0, 1, 1], [], []>} : vector<16x128xf32>, vector<128x128xf32>, vector<16x128xf32> -> vector<16x128xf32>
    %c1_40 = arith.constant 1 : index
    %c0_41 = arith.constant 0 : index
    %c0_42 = arith.constant 0 : index
    %57 = vector.load %arg7[%c1_40, %c0_41, %c0_42] : memref<4x1x128xf32, #tpu.memory_space<vmem>>, vector<1x1x128xf32>
    %58 = vector.shape_cast %57 : vector<1x1x128xf32> to vector<1x128xf32>
    %59 = vector.broadcast %58 : vector<1x128xf32> to vector<16x128xf32>
    %60 = arith.addf %56, %59 : vector<16x128xf32>
    %c2_43 = arith.constant 2 : index
    %c0_44 = arith.constant 0 : index
    %c0_45 = arith.constant 0 : index
    %61 = vector.load %arg4[%c2_43, %c0_44, %c0_45] : memref<4x128x128xf32, #tpu.memory_space<vmem>>, vector<1x128x128xf32>
    %62 = vector.shape_cast %61 : vector<1x128x128xf32> to vector<128x128xf32>
    %cst_46 = arith.constant dense<0.000000e+00> : vector<16x128xf32>
    %63 = tpu.matmul %3, %62, %cst_46 {dimension_numbers = #tpu.dot_dimension_numbers<[1], [0], [0], [1], [0, 0, 1, 1], [], []>} : vector<16x128xf32>, vector<128x128xf32>, vector<16x128xf32> -> vector<16x128xf32>
    %c2_47 = arith.constant 2 : index
    %c0_48 = arith.constant 0 : index
    %c0_49 = arith.constant 0 : index
    %64 = vector.load %arg7[%c2_47, %c0_48, %c0_49] : memref<4x1x128xf32, #tpu.memory_space<vmem>>, vector<1x1x128xf32>
    %65 = vector.shape_cast %64 : vector<1x1x128xf32> to vector<1x128xf32>
    %66 = vector.broadcast %65 : vector<1x128xf32> to vector<16x128xf32>
    %67 = arith.addf %63, %66 : vector<16x128xf32>
    %c3_50 = arith.constant 3 : index
    %c0_51 = arith.constant 0 : index
    %c0_52 = arith.constant 0 : index
    %68 = vector.load %arg4[%c3_50, %c0_51, %c0_52] : memref<4x128x128xf32, #tpu.memory_space<vmem>>, vector<1x128x128xf32>
    %69 = vector.shape_cast %68 : vector<1x128x128xf32> to vector<128x128xf32>
    %cst_53 = arith.constant dense<0.000000e+00> : vector<16x128xf32>
    %70 = tpu.matmul %3, %69, %cst_53 {dimension_numbers = #tpu.dot_dimension_numbers<[1], [0], [0], [1], [0, 0, 1, 1], [], []>} : vector<16x128xf32>, vector<128x128xf32>, vector<16x128xf32> -> vector<16x128xf32>
    %c3_54 = arith.constant 3 : index
    %c0_55 = arith.constant 0 : index
    %c0_56 = arith.constant 0 : index
    %71 = vector.load %arg7[%c3_54, %c0_55, %c0_56] : memref<4x1x128xf32, #tpu.memory_space<vmem>>, vector<1x1x128xf32>
    %72 = vector.shape_cast %71 : vector<1x1x128xf32> to vector<1x128xf32>
    %73 = vector.broadcast %72 : vector<1x128xf32> to vector<16x128xf32>
    %74 = arith.addf %70, %73 : vector<16x128xf32>
    %75 = arith.mulf %53, %43 : vector<16x128xf32>
    %76 = arith.mulf %60, %44 : vector<16x128xf32>
    %77 = arith.subf %75, %76 : vector<16x128xf32>
    %78 = arith.mulf %67, %45 : vector<16x128xf32>
    %79 = arith.subf %77, %78 : vector<16x128xf32>
    %80 = arith.mulf %74, %46 : vector<16x128xf32>
    %81 = arith.subf %79, %80 : vector<16x128xf32>
    %82 = arith.mulf %53, %44 : vector<16x128xf32>
    %83 = arith.mulf %60, %43 : vector<16x128xf32>
    %84 = arith.addf %82, %83 : vector<16x128xf32>
    %85 = arith.mulf %67, %46 : vector<16x128xf32>
    %86 = arith.addf %84, %85 : vector<16x128xf32>
    %87 = arith.mulf %74, %45 : vector<16x128xf32>
    %88 = arith.subf %86, %87 : vector<16x128xf32>
    %89 = arith.mulf %53, %45 : vector<16x128xf32>
    %90 = arith.mulf %60, %46 : vector<16x128xf32>
    %91 = arith.subf %89, %90 : vector<16x128xf32>
    %92 = arith.mulf %67, %43 : vector<16x128xf32>
    %93 = arith.addf %91, %92 : vector<16x128xf32>
    %94 = arith.mulf %74, %44 : vector<16x128xf32>
    %95 = arith.addf %93, %94 : vector<16x128xf32>
    %96 = arith.mulf %53, %46 : vector<16x128xf32>
    %97 = arith.mulf %60, %45 : vector<16x128xf32>
    %98 = arith.addf %96, %97 : vector<16x128xf32>
    %99 = arith.mulf %67, %44 : vector<16x128xf32>
    %100 = arith.subf %98, %99 : vector<16x128xf32>
    %101 = arith.mulf %74, %43 : vector<16x128xf32>
    %102 = arith.addf %100, %101 : vector<16x128xf32>
    %c0_57 = arith.constant 0 : index
    %c0_58 = arith.constant 0 : index
    %103 = vector.load %arg11[%c0_57, %c0_58] : memref<16x128xf32, #tpu.memory_space<vmem>>, vector<16x128xf32>
    %c0_59 = arith.constant 0 : index
    %c0_60 = arith.constant 0 : index
    %c0_61 = arith.constant 0 : index
    %104 = vector.load %arg6[%c0_59, %c0_60, %c0_61] : memref<4x128x128xf32, #tpu.memory_space<vmem>>, vector<1x128x128xf32>
    %105 = vector.shape_cast %104 : vector<1x128x128xf32> to vector<128x128xf32>
    %cst_62 = arith.constant dense<0.000000e+00> : vector<16x128xf32>
    %106 = tpu.matmul %81, %105, %cst_62 {dimension_numbers = #tpu.dot_dimension_numbers<[1], [0], [0], [1], [0, 0, 1, 1], [], []>} : vector<16x128xf32>, vector<128x128xf32>, vector<16x128xf32> -> vector<16x128xf32>
    %c1_63 = arith.constant 1 : index
    %c0_64 = arith.constant 0 : index
    %c0_65 = arith.constant 0 : index
    %107 = vector.load %arg6[%c1_63, %c0_64, %c0_65] : memref<4x128x128xf32, #tpu.memory_space<vmem>>, vector<1x128x128xf32>
    %108 = vector.shape_cast %107 : vector<1x128x128xf32> to vector<128x128xf32>
    %cst_66 = arith.constant dense<0.000000e+00> : vector<16x128xf32>
    %109 = tpu.matmul %88, %108, %cst_66 {dimension_numbers = #tpu.dot_dimension_numbers<[1], [0], [0], [1], [0, 0, 1, 1], [], []>} : vector<16x128xf32>, vector<128x128xf32>, vector<16x128xf32> -> vector<16x128xf32>
    %110 = arith.addf %106, %109 : vector<16x128xf32>
    %c2_67 = arith.constant 2 : index
    %c0_68 = arith.constant 0 : index
    %c0_69 = arith.constant 0 : index
    %111 = vector.load %arg6[%c2_67, %c0_68, %c0_69] : memref<4x128x128xf32, #tpu.memory_space<vmem>>, vector<1x128x128xf32>
    %112 = vector.shape_cast %111 : vector<1x128x128xf32> to vector<128x128xf32>
    %cst_70 = arith.constant dense<0.000000e+00> : vector<16x128xf32>
    %113 = tpu.matmul %95, %112, %cst_70 {dimension_numbers = #tpu.dot_dimension_numbers<[1], [0], [0], [1], [0, 0, 1, 1], [], []>} : vector<16x128xf32>, vector<128x128xf32>, vector<16x128xf32> -> vector<16x128xf32>
    %114 = arith.addf %110, %113 : vector<16x128xf32>
    %c3_71 = arith.constant 3 : index
    %c0_72 = arith.constant 0 : index
    %c0_73 = arith.constant 0 : index
    %115 = vector.load %arg6[%c3_71, %c0_72, %c0_73] : memref<4x128x128xf32, #tpu.memory_space<vmem>>, vector<1x128x128xf32>
    %116 = vector.shape_cast %115 : vector<1x128x128xf32> to vector<128x128xf32>
    %cst_74 = arith.constant dense<0.000000e+00> : vector<16x128xf32>
    %117 = tpu.matmul %102, %116, %cst_74 {dimension_numbers = #tpu.dot_dimension_numbers<[1], [0], [0], [1], [0, 0, 1, 1], [], []>} : vector<16x128xf32>, vector<128x128xf32>, vector<16x128xf32> -> vector<16x128xf32>
    %118 = arith.addf %114, %117 : vector<16x128xf32>
    %119 = arith.addf %103, %118 : vector<16x128xf32>
    %c0_75 = arith.constant 0 : index
    %c0_76 = arith.constant 0 : index
    %120 = vector.load %arg11[%c0_75, %c0_76] : memref<16x128xf32, #tpu.memory_space<vmem>>, vector<16x128xf32>
    tpu.vector_store %arg11[%c0_75, %c0_76], %119 {strides = array<i32>} : memref<16x128xf32, #tpu.memory_space<vmem>>, vector<16x128xf32>,
    %c0_i32_77 = arith.constant 0 : i32
    %121 = arith.cmpi eq, %arg1, %c0_i32_77 : i32
    %122 = arith.extui %121 : i1 to i32
    %c0_i32_78 = arith.constant 0 : i32
    %123 = arith.cmpi ne, %122, %c0_i32_78 : i32
    scf.if %123 {
      %c0_79 = arith.constant 0 : index
      %c0_80 = arith.constant 0 : index
      %124 = vector.load %arg11[%c0_79, %c0_80] : memref<16x128xf32, #tpu.memory_space<vmem>>, vector<16x128xf32>
      %c0_81 = arith.constant 0 : index
      %c0_82 = arith.constant 0 : index
      %125 = vector.load %arg9[%c0_81, %c0_82] : memref<1x128xf32, #tpu.memory_space<vmem>>, vector<1x128xf32>
      %126 = vector.broadcast %125 : vector<1x128xf32> to vector<16x128xf32>
      %127 = arith.addf %124, %126 : vector<16x128xf32>
      %c0_83 = arith.constant 0 : index
      %c0_84 = arith.constant 0 : index
      %128 = vector.load %arg10[%c0_83, %c0_84] : memref<16x128xf32, #tpu.memory_space<vmem>>, vector<16x128xf32>
      tpu.vector_store %arg10[%c0_83, %c0_84], %127 {strides = array<i32>} : memref<16x128xf32, #tpu.memory_space<vmem>>, vector<16x128xf32>,
    } else {
    }
    return
  }
  func.func @transform_0(%arg0: i32, %arg1: i32) -> (i32, i32) {
    %c0_i32 = arith.constant 0 : i32
    %c0_i32_0 = arith.constant 0 : i32
    return %arg0, %c0_i32 : i32, i32
  }
  func.func @transform_1(%arg0: i32, %arg1: i32) -> (i32, i32) {
    %c0_i32 = arith.constant 0 : i32
    %c0_i32_0 = arith.constant 0 : i32
    return %arg0, %c0_i32 : i32, i32
  }
  func.func @transform_2(%arg0: i32, %arg1: i32) -> (i32, i32, i32) {
    %c0_i32 = arith.constant 0 : i32
    %c0_i32_0 = arith.constant 0 : i32
    %c0_i32_1 = arith.constant 0 : i32
    %c0_i32_2 = arith.constant 0 : i32
    return %c0_i32, %c0_i32_0, %c0_i32_1 : i32, i32, i32
  }
  func.func @transform_3(%arg0: i32, %arg1: i32) -> (i32, i32, i32) {
    %c0_i32 = arith.constant 0 : i32
    %c0_i32_0 = arith.constant 0 : i32
    %c0_i32_1 = arith.constant 0 : i32
    %c0_i32_2 = arith.constant 0 : i32
    return %c0_i32, %c0_i32_0, %c0_i32_1 : i32, i32, i32
  }
  func.func @transform_4(%arg0: i32, %arg1: i32) -> (i32, i32, i32) {
    %c0_i32 = arith.constant 0 : i32
    %c0_i32_0 = arith.constant 0 : i32
    %c0_i32_1 = arith.constant 0 : i32
    %c0_i32_2 = arith.constant 0 : i32
    return %c0_i32, %c0_i32_0, %c0_i32_1 : i32, i32, i32
  }
  func.func @transform_5(%arg0: i32, %arg1: i32) -> (i32, i32, i32) {
    %c0_i32 = arith.constant 0 : i32
    %c0_i32_0 = arith.constant 0 : i32
    %c0_i32_1 = arith.constant 0 : i32
    %c0_i32_2 = arith.constant 0 : i32
    return %c0_i32, %c0_i32_0, %c0_i32_1 : i32, i32, i32
  }
  func.func @transform_6(%arg0: i32, %arg1: i32) -> (i32, i32, i32) {
    %c0_i32 = arith.constant 0 : i32
    %c0_i32_0 = arith.constant 0 : i32
    %c0_i32_1 = arith.constant 0 : i32
    %c0_i32_2 = arith.constant 0 : i32
    return %c0_i32, %c0_i32_0, %c0_i32_1 : i32, i32, i32
  }
  func.func @transform_7(%arg0: i32, %arg1: i32) -> (i32, i32) {
    %c0_i32 = arith.constant 0 : i32
    %c0_i32_0 = arith.constant 0 : i32
    %c0_i32_1 = arith.constant 0 : i32
    return %c0_i32, %c0_i32_0 : i32, i32
  }
  func.func @transform_8(%arg0: i32, %arg1: i32) -> (i32, i32) {
    %c0_i32 = arith.constant 0 : i32
    %c0_i32_0 = arith.constant 0 : i32
    return %arg0, %c0_i32 : i32, i32
  }
}

</mosaic_0001>

<bundles_post_ra>
// kernel: qrot_mlp_forward.1
= control target key start
LH: loop header
LB: loop body
LE: loop exit
PB: predicated region body
PF: predicated region fallthrough
CT: control target
= control target key end

     0   :  { %13 = vsyncpa [#allocation4], 0  ;;  %s2265_s0 = inlined_call_operand.vmem [shape: f32[16,128], index: 0, kind: input, shape index: {}]   ;;  %s2266_s1 = inlined_call_operand.vmem [shape: f32[16,128], index: 1, kind: input, shape index: {}]   ;;  %s2267_s2 = inlined_call_operand.hbm [shape: f32[4,128,128], index: 2, kind: input, shape index: {}]   ;;  %s2268_s3 = inlined_call_operand.hbm [shape: f32[4,128,128], index: 3, kind: input, shape index: {}]   ;;  %s2269_s4 = inlined_call_operand.hbm [shape: f32[4,128,128], index: 4, kind: input, shape index: {}]   ;;  %s2270_s5 = inlined_call_operand.vmem [shape: f32[4,1,128], index: 5, kind: input, shape index: {}]   ;;  %s2271_s6 = inlined_call_operand.vmem [shape: f32[4,1,128], index: 6, kind: input, shape index: {}]   ;;  %s2272_s7 = inlined_call_operand.vmem [shape: f32[1,128], index: 7, kind: input, shape index: {}]   ;;  %s2273_s8 = inlined_call_operand.vmem [shape: f32[16,128], index: 8, kind: output, shape index: {}]  }
   0x1   :  { %14 = vsyncpa [#allocation6], 0  ;;  %s2081_s27 = smov [#allocation5]   ;;  %s2082_s29 = smov [#allocation3]  }
   0x2   :  { %s36_s28 = sshll.u32 %s2081_s27, 4  ;;  %s24_s30 = sshll.u32 %s2082_s29, 4  ;;  %s37_s28 = int_to_ptr.vmem [resolvable:$true] %s36_s28  ;;  %s25_s30 = int_to_ptr.vmem [resolvable:$true] %s24_s30 }
   0x3   :  { %s2025_s9 = scalar_lea.vmem %s37_s28, 8192  ;;  %p2030_p1 = scmp.lt.s32.totalorder %s37_s28, %s37_s28 }
   0x4   :  { %p2026_p0 = scmp.ne.s32.totalorder %s37_s28, %s2025_s9  ;;  %p2031_p2 = scmp.lt.s32.totalorder %s2025_s9, %s2025_s9 }
   0x6   :  { %p2032_p3 = por %p2031_p2, %p2030_p1 }
   0x8   :  { %p2033_p4 = pnand %p2032_p3, %p2026_p0 }
   0xa   :  { %2036 = shalt.err (!%p2033_p4)
}
   0xb   :  { %s2083_s10 = smov 128   ;;  %s2084_s11 = smov 8  }
   0xc   :  { %42 = dma.hbm_to_vmem [thread:$0]  %s2268_s3, 8192, %s37_s28, [#allocation6], %s2083_s10, %s2083_s10, %s2084_s11  }
   0xd   :  { %s2045_s14 = scalar_lea.vmem %s25_s30, 8192  ;;  %p2050_p6 = scmp.lt.s32.totalorder %s25_s30, %s25_s30 }
   0xe   :  { %p2046_p5 = scmp.ne.s32.totalorder %s25_s30, %s2045_s14  ;;  %p2051_p7 = scmp.lt.s32.totalorder %s2045_s14, %s2045_s14 }
  0x10   :  { %p2052_p8 = por %p2051_p7, %p2050_p6 }
  0x12   :  { %p2053_p9 = pnand %p2052_p8, %p2046_p5 }
  0x14   :  { %2056 = shalt.err (!%p2053_p9)
}
  0x15   :  { %30 = dma.hbm_to_vmem [thread:$0]  %s2267_s2, 8192, %s25_s30, [#allocation4], %s2083_s10, %s2083_s10, %s2084_s11  }
  0x16   :  { %s2085_s17 = smov [#allocation7]  }
  0x17   :  { %s48_s18 = sshll.u32 %s2085_s17, 4  ;;  %s49_s18 = int_to_ptr.vmem [resolvable:$true] %s48_s18 }
  0x18   :  { %s2065_s19 = scalar_lea.vmem %s49_s18, 8192  ;;  %p2070_p11 = scmp.lt.s32.totalorder %s49_s18, %s49_s18 }
  0x19   :  { %p2066_p10 = scmp.ne.s32.totalorder %s49_s18, %s2065_s19  ;;  %p2071_p12 = scmp.lt.s32.totalorder %s2065_s19, %s2065_s19 }
  0x1b   :  { %p2072_p13 = por %p2071_p12, %p2070_p11 }
  0x1d   :  { %p2073_p0 = pnand %p2072_p13, %p2066_p10 }
  0x1f   :  { %2076 = shalt.err (!%p2073_p0)
}
  0x20   :  { %54 = dma.hbm_to_vmem [thread:$0]  %s2269_s4, 8192, %s49_s18, [#allocation6], %s2083_s10, %s2083_s10, %s2084_s11  }
  0x21   :  { %2077 = dma.done.wait [#allocation4], 8192  }
  0x22   :  { %2078 = vsyncadd [#allocation4], 4294959104 }
  0x23   :  { %2079 = dma.done.wait [#allocation6], 16384  }
  0x24   :  { %2080 = vsyncadd [#allocation6], 4294950912  ;;  %v95_v0 = vld [vmem:[#allocation5 + $0x78] sm:$0xff]  ;;  %v94_v2 = vld [vmem:[#allocation5 + $0x70] sm:$0xff] }
  0x25   :  { %v194_v1 = vld [vmem:[#allocation5 + $0xf8] sm:$0xff]  ;;  %1588 = vmatprep.subr.mxu0 %v95_v0  ;;  %v193_v3 = vld [vmem:[#allocation5 + $0xf0] sm:$0xff]  ;;  %v93_v4 = vld [vmem:[#allocation5 + $0x68] sm:$0xff] }
  0x26   :  { %1623 = vmatprep.subr.mxu1 %v194_v1  ;;  %1589 = vmatpush3.msra.mxu0 %v95_v0  ;;  %v192_v5 = vld [vmem:[#allocation5 + $0xe8] sm:$0xff]  ;;  %v92_v6 = vld [vmem:[#allocation5 + $0x60] sm:$0xff]  ;;  %v91_v8 = vld [vmem:[#allocation5 + $0x58] sm:$0xff] }
  0x27   :  { %1624 = vmatpush3.msra.mxu1 %v194_v1  ;;  %1590 = vmatprep.subr.mxu0 %v94_v2  ;;  %v191_v7 = vld [vmem:[#allocation5 + $0xe0] sm:$0xff]  ;;  %v190_v9 = vld [vmem:[#allocation5 + $0xd8] sm:$0xff]  ;;  %v90_v10 = vld [vmem:[#allocation5 + $0x50] sm:$0xff] }
  0x28   :  { %1625 = vmatprep.subr.mxu1 %v193_v3  ;;  %1591 = vmatpush3.msra.mxu0 %v94_v2  ;;  %v189_v11 = vld [vmem:[#allocation5 + $0xd0] sm:$0xff]  ;;  %v89_v12 = vld [vmem:[#allocation5 + $0x48] sm:$0xff]  ;;  %v88_v14 = vld [vmem:[#allocation5 + $0x40] sm:$0xff] }
  0x29   :  { %1626 = vmatpush3.msra.mxu1 %v193_v3  ;;  %1592 = vmatprep.subr.mxu0 %v93_v4  ;;  %v188_v13 = vld [vmem:[#allocation5 + $0xc8] sm:$0xff]  ;;  %v187_v15 = vld [vmem:[#allocation5 + $0xc0] sm:$0xff]  ;;  %v87_v16 = vld [vmem:[#allocation5 + $0x38] sm:$0xff] }
  0x2a   :  { %1627 = vmatprep.subr.mxu1 %v192_v5  ;;  %1593 = vmatpush3.msra.mxu0 %v93_v4  ;;  %v186_v17 = vld [vmem:[#allocation5 + $0xb8] sm:$0xff]  ;;  %v86_v18 = vld [vmem:[#allocation5 + $0x30] sm:$0xff]  ;;  %v85_v20 = vld [vmem:[#allocation5 + $0x28] sm:$0xff] }
  0x2b   :  { %1628 = vmatpush3.msra.mxu1 %v192_v5  ;;  %1594 = vmatprep.subr.mxu0 %v92_v6  ;;  %v185_v19 = vld [vmem:[#allocation5 + $0xb0] sm:$0xff]  ;;  %v184_v21 = vld [vmem:[#allocation5 + $0xa8] sm:$0xff]  ;;  %v84_v22 = vld [vmem:[#allocation5 + $0x20] sm:$0xff] }
  0x2c   :  { %1629 = vmatprep.subr.mxu1 %v191_v7  ;;  %1595 = vmatpush3.msra.mxu0 %v92_v6  ;;  %v183_v23 = vld [vmem:[#allocation5 + $0xa0] sm:$0xff]  ;;  %v83_v24 = vld [vmem:[#allocation5 + $0x18] sm:$0xff]  ;;  %v82_v26 = vld [vmem:[#allocation5 + $0x10] sm:$0xff] }
  0x2d   :  { %1630 = vmatpush3.msra.mxu1 %v191_v7  ;;  %1596 = vmatprep.subr.mxu0 %v91_v8  ;;  %v182_v25 = vld [vmem:[#allocation5 + $0x98] sm:$0xff]  ;;  %v181_v27 = vld [vmem:[#allocation5 + $0x90] sm:$0xff]  ;;  %v81_v28 = vld [vmem:[#allocation5 + $0x8] sm:$0xff] }
  0x2e   :  { %1631 = vmatprep.subr.mxu1 %v190_v9  ;;  %1597 = vmatpush3.msra.mxu0 %v91_v8  ;;  %v180_v29 = vld [vmem:[#allocation5 + $0x88] sm:$0xff]  ;;  %v80_v30 = vld [vmem:[#allocation5] sm:$0xff]  ;;  %v294_v34 = vld [vmem:[#allocation5 + $0x178] sm:$0xff] }
  0x2f   :  { %1632 = vmatpush3.msra.mxu1 %v190_v9  ;;  %1598 = vmatprep.subr.mxu0 %v90_v10  ;;  %v179_v31 = vld [vmem:[#allocation5 + $0x80] sm:$0xff]  ;;  %v2148_v33 = vld [vmem:[%s2266_s1 + $0x8] sm:$0xff]  ;;  %v394_v35 = vld [vmem:[#allocation5 + $0x1f8] sm:$0xff] }
  0x30   :  { %1633 = vmatprep.subr.mxu1 %v189_v11  ;;  %1599 = vmatpush3.msra.mxu0 %v90_v10  ;;  %v2143_v32 = vld [vmem:[%s2266_s1] sm:$0xff]  ;;  %v293_v36 = vld [vmem:[#allocation5 + $0x170] sm:$0xff]  ;;  %v292_v38 = vld [vmem:[#allocation5 + $0x168] sm:$0xff] }
  0x31   :  { %1634 = vmatpush3.msra.mxu1 %v189_v11  ;;  %1600 = vmatprep.subr.mxu0 %v89_v12  ;;  %v393_v37 = vld [vmem:[#allocation5 + $0x1f0] sm:$0xff]  ;;  %v392_v39 = vld [vmem:[#allocation5 + $0x1e8] sm:$0xff]  ;;  %v291_v40 = vld [vmem:[#allocation5 + $0x160] sm:$0xff] }
  0x32   :  { %1635 = vmatprep.subr.mxu1 %v188_v13  ;;  %1601 = vmatpush3.msra.mxu0 %v89_v12  ;;  %v391_v41 = vld [vmem:[#allocation5 + $0x1e0] sm:$0xff]  ;;  %v290_v42 = vld [vmem:[#allocation5 + $0x158] sm:$0xff]  ;;  %v289_v44 = vld [vmem:[#allocation5 + $0x150] sm:$0xff] }
  0x33   :  { %1636 = vmatpush3.msra.mxu1 %v188_v13  ;;  %1602 = vmatprep.subr.mxu0 %v88_v14  ;;  %v390_v43 = vld [vmem:[#allocation5 + $0x1d8] sm:$0xff]  ;;  %v389_v45 = vld [vmem:[#allocation5 + $0x1d0] sm:$0xff]  ;;  %v288_v46 = vld [vmem:[#allocation5 + $0x148] sm:$0xff] }
  0x34   :  { %1637 = vmatprep.subr.mxu1 %v187_v15  ;;  %1603 = vmatpush3.msra.mxu0 %v88_v14  ;;  %v388_v47 = vld [vmem:[#allocation5 + $0x1c8] sm:$0xff]  ;;  %v287_v48 = vld [vmem:[#allocation5 + $0x140] sm:$0xff]  ;;  %v286_v50 = vld [vmem:[#allocation5 + $0x138] sm:$0xff] }
  0x35   :  { %1638 = vmatpush3.msra.mxu1 %v187_v15  ;;  %1604 = vmatprep.subr.mxu0 %v87_v16  ;;  %v387_v49 = vld [vmem:[#allocation5 + $0x1c0] sm:$0xff]  ;;  %v386_v51 = vld [vmem:[#allocation5 + $0x1b8] sm:$0xff]  ;;  %v285_v52 = vld [vmem:[#allocation5 + $0x130] sm:$0xff] }
  0x36   :  { %1639 = vmatprep.subr.mxu1 %v186_v17  ;;  %1605 = vmatpush3.msra.mxu0 %v87_v16  ;;  %v385_v53 = vld [vmem:[#allocation5 + $0x1b0] sm:$0xff]  ;;  %v284_v54 = vld [vmem:[#allocation5 + $0x128] sm:$0xff]  ;;  %v283_v56 = vld [vmem:[#allocation5 + $0x120] sm:$0xff] }
  0x37   :  { %1640 = vmatpush3.msra.mxu1 %v186_v17  ;;  %1606 = vmatprep.subr.mxu0 %v86_v18  ;;  %v384_v55 = vld [vmem:[#allocation5 + $0x1a8] sm:$0xff]  ;;  %v383_v57 = vld [vmem:[#allocation5 + $0x1a0] sm:$0xff]  ;;  %v282_v58 = vld [vmem:[#allocation5 + $0x118] sm:$0xff] }
  0x38   :  { %1641 = vmatprep.subr.mxu1 %v185_v19  ;;  %1607 = vmatpush3.msra.mxu0 %v86_v18  ;;  %v382_v59 = vld [vmem:[#allocation5 + $0x198] sm:$0xff]  ;;  %v281_v60 = vld [vmem:[#allocation5 + $0x110] sm:$0xff]  ;;  %v280_v62 = vld [vmem:[#allocation5 + $0x108] sm:$0xff] }
  0x39   :  { %1642 = vmatpush3.msra.mxu1 %v185_v19  ;;  %1608 = vmatprep.subr.mxu0 %v85_v20  ;;  %v381_v61 = vld [vmem:[#allocation5 + $0x190] sm:$0xff]  ;;  %v380_v63 = vld [vmem:[#allocation5 + $0x188] sm:$0xff]  ;;  %v279_v0 = vld [vmem:[#allocation5 + $0x100] sm:$0xff] }
  0x3a   :  { %1643 = vmatprep.subr.mxu1 %v184_v21  ;;  %1609 = vmatpush3.msra.mxu0 %v85_v20  ;;  %v379_v1 = vld [vmem:[#allocation5 + $0x180] sm:$0xff]  ;;  %v519_v2 = vld [vmem:[#allocation3 + $0x78] sm:$0xff]  ;;  %v518_v4 = vld [vmem:[#allocation3 + $0x70] sm:$0xff] }
  0x3b   :  { %1644 = vmatpush3.msra.mxu1 %v184_v21  ;;  %1610 = vmatprep.subr.mxu0 %v84_v22  ;;  %v618_v3 = vld [vmem:[#allocation3 + $0xf8] sm:$0xff]  ;;  %v617_v5 = vld [vmem:[#allocation3 + $0xf0] sm:$0xff]  ;;  %v517_v6 = vld [vmem:[#allocation3 + $0x68] sm:$0xff] }
  0x3c   :  { %1645 = vmatprep.subr.mxu1 %v183_v23  ;;  %1611 = vmatpush3.msra.mxu0 %v84_v22  ;;  %v616_v7 = vld [vmem:[#allocation3 + $0xe8] sm:$0xff]  ;;  %v516_v8 = vld [vmem:[#allocation3 + $0x60] sm:$0xff]  ;;  %v515_v10 = vld [vmem:[#allocation3 + $0x58] sm:$0xff] }
  0x3d   :  { %1646 = vmatpush3.msra.mxu1 %v183_v23  ;;  %1612 = vmatprep.subr.mxu0 %v83_v24  ;;  %v615_v9 = vld [vmem:[#allocation3 + $0xe0] sm:$0xff]  ;;  %v614_v11 = vld [vmem:[#allocation3 + $0xd8] sm:$0xff]  ;;  %v514_v12 = vld [vmem:[#allocation3 + $0x50] sm:$0xff] }
  0x3e   :  { %1647 = vmatprep.subr.mxu1 %v182_v25  ;;  %1613 = vmatpush3.msra.mxu0 %v83_v24  ;;  %v613_v13 = vld [vmem:[#allocation3 + $0xd0] sm:$0xff]  ;;  %v513_v14 = vld [vmem:[#allocation3 + $0x48] sm:$0xff]  ;;  %v512_v16 = vld [vmem:[#allocation3 + $0x40] sm:$0xff] }
  0x3f   :  { %1648 = vmatpush3.msra.mxu1 %v182_v25  ;;  %1614 = vmatprep.subr.mxu0 %v82_v26  ;;  %v612_v15 = vld [vmem:[#allocation3 + $0xc8] sm:$0xff]  ;;  %v611_v17 = vld [vmem:[#allocation3 + $0xc0] sm:$0xff]  ;;  %v511_v18 = vld [vmem:[#allocation3 + $0x38] sm:$0xff] }
  0x40   :  { %1649 = vmatprep.subr.mxu1 %v181_v27  ;;  %1615 = vmatpush3.msra.mxu0 %v82_v26  ;;  %v610_v19 = vld [vmem:[#allocation3 + $0xb8] sm:$0xff]  ;;  %v510_v20 = vld [vmem:[#allocation3 + $0x30] sm:$0xff]  ;;  %v509_v22 = vld [vmem:[#allocation3 + $0x28] sm:$0xff] }
  0x41   :  { %1650 = vmatpush3.msra.mxu1 %v181_v27  ;;  %1616 = vmatprep.subr.mxu0 %v81_v28  ;;  %v609_v21 = vld [vmem:[#allocation3 + $0xb0] sm:$0xff]  ;;  %v608_v23 = vld [vmem:[#allocation3 + $0xa8] sm:$0xff]  ;;  %v508_v24 = vld [vmem:[#allocation3 + $0x20] sm:$0xff] }
  0x42   :  { %1651 = vmatprep.subr.mxu1 %v180_v29  ;;  %1617 = vmatpush3.msra.mxu0 %v81_v28  ;;  %v607_v25 = vld [vmem:[#allocation3 + $0xa0] sm:$0xff]  ;;  %v507_v26 = vld [vmem:[#allocation3 + $0x18] sm:$0xff]  ;;  %v506_v28 = vld [vmem:[#allocation3 + $0x10] sm:$0xff] }
  0x43   :  { %1652 = vmatpush3.msra.mxu1 %v180_v29  ;;  %1618 = vmatprep.subr.mxu0 %v80_v30  ;;  %v606_v27 = vld [vmem:[#allocation3 + $0x98] sm:$0xff]  ;;  %v605_v29 = vld [vmem:[#allocation3 + $0x90] sm:$0xff] }
  0x44   :  { %1653 = vmatprep.subr.mxu1 %v179_v31  ;;  %1619 = vmatpush3.msra.mxu0 %v80_v30  ;;  %v505_v30 = vld [vmem:[#allocation3 + $0x8] sm:$0xff] }
  0x45   :  { %1620 = vmatprep.mubr.f32.mxu0 %v2143_v32  ;;  %1654 = vmatpush3.msra.mxu1 %v179_v31  ;;  %v604_v31 = vld [vmem:[#allocation3 + $0x88] sm:$0xff] }
  0x46   :  { %1655 = vmatprep.mubr.f32.mxu1 %v2143_v32  ;;  %1621 = vmatmul.mubr.f32.vlgmr.msra.gmra.mxu0 %v2148_v33 }
  0x47   :  { %1656 = vmatmul.mubr.f32.vlgmr.msra.gmra.mxu1 %v2148_v33  ;;  %1658 = vmatprep.subr.mxu0 %v294_v34 }
  0x48   :  { %1693 = vmatprep.subr.mxu1 %v394_v35  ;;  %1659 = vmatpush3.msra.mxu0 %v294_v34  ;;  %v2161_v34 = vld [vmem:[%s2265_s0] sm:$0xff] }
  0x49   :  { %1694 = vmatpush3.msra.mxu1 %v394_v35  ;;  %1660 = vmatprep.subr.mxu0 %v293_v36  ;;  %v2166_v35 = vld [vmem:[%s2265_s0 + $0x8] sm:$0xff] }
  0x4a   :  { %1695 = vmatprep.subr.mxu1 %v393_v37  ;;  %1661 = vmatpush3.msra.mxu0 %v293_v36  ;;  %v718_v36 = vld [vmem:[#allocation3 + $0x178] sm:$0xff] }
  0x4b   :  { %1696 = vmatpush3.msra.mxu1 %v393_v37  ;;  %1662 = vmatprep.subr.mxu0 %v292_v38  ;;  %v818_v37 = vld [vmem:[#allocation3 + $0x1f8] sm:$0xff] }
  0x4c   :  { %1697 = vmatprep.subr.mxu1 %v392_v39  ;;  %1663 = vmatpush3.msra.mxu0 %v292_v38  ;;  %v717_v38 = vld [vmem:[#allocation3 + $0x170] sm:$0xff] }
  0x4d   :  { %1698 = vmatpush3.msra.mxu1 %v392_v39  ;;  %1664 = vmatprep.subr.mxu0 %v291_v40  ;;  %v817_v39 = vld [vmem:[#allocation3 + $0x1f0] sm:$0xff] }
  0x4e   :  { %1699 = vmatprep.subr.mxu1 %v391_v41  ;;  %1665 = vmatpush3.msra.mxu0 %v291_v40  ;;  %v716_v40 = vld [vmem:[#allocation3 + $0x168] sm:$0xff] }
  0x4f   :  { %1700 = vmatpush3.msra.mxu1 %v391_v41  ;;  %1666 = vmatprep.subr.mxu0 %v290_v42  ;;  %v816_v41 = vld [vmem:[#allocation3 + $0x1e8] sm:$0xff] }
  0x50   :  { %1701 = vmatprep.subr.mxu1 %v390_v43  ;;  %1667 = vmatpush3.msra.mxu0 %v290_v42  ;;  %v715_v42 = vld [vmem:[#allocation3 + $0x160] sm:$0xff] }
  0x51   :  { %1702 = vmatpush3.msra.mxu1 %v390_v43  ;;  %1668 = vmatprep.subr.mxu0 %v289_v44  ;;  %v815_v43 = vld [vmem:[#allocation3 + $0x1e0] sm:$0xff] }
  0x52   :  { %1703 = vmatprep.subr.mxu1 %v389_v45  ;;  %1669 = vmatpush3.msra.mxu0 %v289_v44  ;;  %v714_v44 = vld [vmem:[#allocation3 + $0x158] sm:$0xff] }
  0x53   :  { %1704 = vmatpush3.msra.mxu1 %v389_v45  ;;  %1670 = vmatprep.subr.mxu0 %v288_v46  ;;  %v814_v45 = vld [vmem:[#allocation3 + $0x1d8] sm:$0xff] }
  0x54   :  { %1705 = vmatprep.subr.mxu1 %v388_v47  ;;  %1671 = vmatpush3.msra.mxu0 %v288_v46  ;;  %v713_v46 = vld [vmem:[#allocation3 + $0x150] sm:$0xff] }
  0x55   :  { %1706 = vmatpush3.msra.mxu1 %v388_v47  ;;  %1672 = vmatprep.subr.mxu0 %v287_v48  ;;  %v813_v47 = vld [vmem:[#allocation3 + $0x1d0] sm:$0xff] }
  0x56   :  { %1707 = vmatprep.subr.mxu1 %v387_v49  ;;  %1673 = vmatpush3.msra.mxu0 %v287_v48  ;;  %v712_v48 = vld [vmem:[#allocation3 + $0x148] sm:$0xff] }
  0x57   :  { %1708 = vmatpush3.msra.mxu1 %v387_v49  ;;  %1674 = vmatprep.subr.mxu0 %v286_v50  ;;  %v812_v49 = vld [vmem:[#allocation3 + $0x1c8] sm:$0xff] }
  0x58   :  { %1709 = vmatprep.subr.mxu1 %v386_v51  ;;  %1675 = vmatpush3.msra.mxu0 %v286_v50  ;;  %v711_v50 = vld [vmem:[#allocation3 + $0x140] sm:$0xff] }
  0x59   :  { %1710 = vmatpush3.msra.mxu1 %v386_v51  ;;  %1676 = vmatprep.subr.mxu0 %v285_v52  ;;  %v811_v51 = vld [vmem:[#allocation3 + $0x1c0] sm:$0xff] }
  0x5a   :  { %1711 = vmatprep.subr.mxu1 %v385_v53  ;;  %1677 = vmatpush3.msra.mxu0 %v285_v52  ;;  %v710_v52 = vld [vmem:[#allocation3 + $0x138] sm:$0xff] }
  0x5b   :  { %1712 = vmatpush3.msra.mxu1 %v385_v53  ;;  %1678 = vmatprep.subr.mxu0 %v284_v54  ;;  %v810_v53 = vld [vmem:[#allocation3 + $0x1b8] sm:$0xff] }
  0x5c   :  { %1713 = vmatprep.subr.mxu1 %v384_v55  ;;  %1679 = vmatpush3.msra.mxu0 %v284_v54  ;;  %v709_v54 = vld [vmem:[#allocation3 + $0x130] sm:$0xff] }
  0x5d   :  { %1714 = vmatpush3.msra.mxu1 %v384_v55  ;;  %1680 = vmatprep.subr.mxu0 %v283_v56  ;;  %v809_v55 = vld [vmem:[#allocation3 + $0x1b0] sm:$0xff] }
  0x5e   :  { %1715 = vmatprep.subr.mxu1 %v383_v57  ;;  %1681 = vmatpush3.msra.mxu0 %v283_v56  ;;  %v708_v56 = vld [vmem:[#allocation3 + $0x128] sm:$0xff] }
  0x5f   :  { %1716 = vmatpush3.msra.mxu1 %v383_v57  ;;  %1682 = vmatprep.subr.mxu0 %v282_v58  ;;  %v808_v57 = vld [vmem:[#allocation3 + $0x1a8] sm:$0xff] }
  0x60   :  { %1717 = vmatprep.subr.mxu1 %v382_v59  ;;  %1683 = vmatpush3.msra.mxu0 %v282_v58  ;;  %v707_v58 = vld [vmem:[#allocation3 + $0x120] sm:$0xff] }
  0x61   :  { %1718 = vmatpush3.msra.mxu1 %v382_v59  ;;  %1684 = vmatprep.subr.mxu0 %v281_v60  ;;  %v807_v59 = vld [vmem:[#allocation3 + $0x1a0] sm:$0xff] }
  0x62   :  { %1719 = vmatprep.subr.mxu1 %v381_v61  ;;  %1685 = vmatpush3.msra.mxu0 %v281_v60  ;;  %v706_v60 = vld [vmem:[#allocation3 + $0x118] sm:$0xff] }
  0x63   :  { %1720 = vmatpush3.msra.mxu1 %v381_v61  ;;  %1686 = vmatprep.subr.mxu0 %v280_v62  ;;  %v806_v61 = vld [vmem:[#allocation3 + $0x198] sm:$0xff] }
  0x64   :  { %1721 = vmatprep.subr.mxu1 %v380_v63  ;;  %1687 = vmatpush3.msra.mxu0 %v280_v62  ;;  %v705_v62 = vld [vmem:[#allocation3 + $0x110] sm:$0xff] }
  0x65   :  { %1722 = vmatpush3.msra.mxu1 %v380_v63  ;;  %1688 = vmatprep.subr.mxu0 %v279_v0  ;;  %v805_v63 = vld [vmem:[#allocation3 + $0x190] sm:$0xff] }
  0x66   :  { %1723 = vmatprep.subr.mxu1 %v379_v1  ;;  %1689 = vmatpush3.msra.mxu0 %v279_v0  ;;  %v704_v0 = vld [vmem:[#allocation3 + $0x108] sm:$0xff] }
  0x67   :  { %1690 = vmatprep.mubr.f32.mxu0 %v2143_v32  ;;  %1724 = vmatpush3.msra.mxu1 %v379_v1  ;;  %v804_v1 = vld [vmem:[#allocation3 + $0x188] sm:$0xff] }
  0x68   :  { %1691 = vmatmul.mubr.f32.vlgmr.msra.gmra.mxu0 %v2148_v33  ;;  %1725 = vmatprep.mubr.f32.mxu1 %v2143_v32  ;;  %v504_v32 = vld [vmem:[#allocation3] sm:$0xff] }
  0x69   :  { %1728 = vmatprep.subr.mxu0 %v519_v2  ;;  %1763 = vmatprep.subr.mxu1 %v618_v3 }
  0x6a   :  { %1726 = vmatmul.mubr.f32.vlgmr.msra.gmra.mxu1 %v2148_v33  ;;  %1729 = vmatpush3.msra.mxu0 %v519_v2  ;;  %v603_v33 = vld [vmem:[#allocation3 + $0x80] sm:$0xff] }
  0x6b   :  { %1764 = vmatpush3.msra.mxu1 %v618_v3  ;;  %1730 = vmatprep.subr.mxu0 %v518_v4  ;;  %v703_v2 = vld [vmem:[#allocation3 + $0x100] sm:$0xff] }
  0x6c   :  { %1765 = vmatprep.subr.mxu1 %v617_v5  ;;  %1731 = vmatpush3.msra.mxu0 %v518_v4  ;;  %v803_v3 = vld [vmem:[#allocation3 + $0x180] sm:$0xff]  ;;  %v992_v4 = vld [vmem:[#allocation7 + $0xf8] sm:$0xff] }
  0x6d   :  { %1766 = vmatpush3.msra.mxu1 %v617_v5  ;;  %1732 = vmatprep.subr.mxu0 %v517_v6  ;;  %v975_v5 = vld [vmem:[#allocation7 + $0x78] sm:$0xff] }
  0x6e   :  { %1767 = vmatprep.subr.mxu1 %v616_v7  ;;  %1733 = vmatpush3.msra.mxu0 %v517_v6  ;;  %v991_v6 = vld [vmem:[#allocation7 + $0xf0] sm:$0xff] }
  0x6f   :  { %1768 = vmatpush3.msra.mxu1 %v616_v7  ;;  %1734 = vmatprep.subr.mxu0 %v516_v8  ;;  %v974_v7 = vld [vmem:[#allocation7 + $0x70] sm:$0xff] }
  0x70   :  { %1769 = vmatprep.subr.mxu1 %v615_v9  ;;  %1735 = vmatpush3.msra.mxu0 %v516_v8  ;;  %v990_v8 = vld [vmem:[#allocation7 + $0xe8] sm:$0xff] }
  0x71   :  { %1770 = vmatpush3.msra.mxu1 %v615_v9  ;;  %1736 = vmatprep.subr.mxu0 %v515_v10  ;;  %v973_v9 = vld [vmem:[#allocation7 + $0x68] sm:$0xff] }
  0x72   :  { %1771 = vmatprep.subr.mxu1 %v614_v11  ;;  %1737 = vmatpush3.msra.mxu0 %v515_v10  ;;  %v989_v10 = vld [vmem:[#allocation7 + $0xe0] sm:$0xff] }
  0x73   :  { %1772 = vmatpush3.msra.mxu1 %v614_v11  ;;  %1738 = vmatprep.subr.mxu0 %v514_v12  ;;  %v972_v11 = vld [vmem:[#allocation7 + $0x60] sm:$0xff] }
  0x74   :  { %1773 = vmatprep.subr.mxu1 %v613_v13  ;;  %1739 = vmatpush3.msra.mxu0 %v514_v12  ;;  %v988_v12 = vld [vmem:[#allocation7 + $0xd8] sm:$0xff] }
  0x75   :  { %1774 = vmatpush3.msra.mxu1 %v613_v13  ;;  %1740 = vmatprep.subr.mxu0 %v513_v14  ;;  %v971_v13 = vld [vmem:[#allocation7 + $0x58] sm:$0xff] }
  0x76   :  { %1775 = vmatprep.subr.mxu1 %v612_v15  ;;  %1741 = vmatpush3.msra.mxu0 %v513_v14  ;;  %v987_v14 = vld [vmem:[#allocation7 + $0xd0] sm:$0xff] }
  0x77   :  { %1776 = vmatpush3.msra.mxu1 %v612_v15  ;;  %1742 = vmatprep.subr.mxu0 %v512_v16  ;;  %v970_v15 = vld [vmem:[#allocation7 + $0x50] sm:$0xff] }
  0x78   :  { %1777 = vmatprep.subr.mxu1 %v611_v17  ;;  %1743 = vmatpush3.msra.mxu0 %v512_v16  ;;  %v986_v16 = vld [vmem:[#allocation7 + $0xc8] sm:$0xff] }
  0x79   :  { %1778 = vmatpush3.msra.mxu1 %v611_v17  ;;  %1744 = vmatprep.subr.mxu0 %v511_v18  ;;  %v969_v17 = vld [vmem:[#allocation7 + $0x48] sm:$0xff] }
  0x7a   :  { %1779 = vmatprep.subr.mxu1 %v610_v19  ;;  %1745 = vmatpush3.msra.mxu0 %v511_v18  ;;  %v985_v18 = vld [vmem:[#allocation7 + $0xc0] sm:$0xff] }
  0x7b   :  { %1780 = vmatpush3.msra.mxu1 %v610_v19  ;;  %1746 = vmatprep.subr.mxu0 %v510_v20  ;;  %v968_v19 = vld [vmem:[#allocation7 + $0x40] sm:$0xff] }
  0x7c   :  { %1781 = vmatprep.subr.mxu1 %v609_v21  ;;  %1747 = vmatpush3.msra.mxu0 %v510_v20  ;;  %v984_v20 = vld [vmem:[#allocation7 + $0xb8] sm:$0xff] }
  0x7d   :  { %1782 = vmatpush3.msra.mxu1 %v609_v21  ;;  %1748 = vmatprep.subr.mxu0 %v509_v22  ;;  %v967_v21 = vld [vmem:[#allocation7 + $0x38] sm:$0xff] }
  0x7e   :  { %1783 = vmatprep.subr.mxu1 %v608_v23  ;;  %1749 = vmatpush3.msra.mxu0 %v509_v22  ;;  %v983_v22 = vld [vmem:[#allocation7 + $0xb0] sm:$0xff] }
  0x7f   :  { %1784 = vmatpush3.msra.mxu1 %v608_v23  ;;  %1750 = vmatprep.subr.mxu0 %v508_v24  ;;  %v966_v23 = vld [vmem:[#allocation7 + $0x30] sm:$0xff] }
  0x80   :  { %1785 = vmatprep.subr.mxu1 %v607_v25  ;;  %1751 = vmatpush3.msra.mxu0 %v508_v24  ;;  %v982_v24 = vld [vmem:[#allocation7 + $0xa8] sm:$0xff] }
  0x81   :  { %1786 = vmatpush3.msra.mxu1 %v607_v25  ;;  %1752 = vmatprep.subr.mxu0 %v507_v26  ;;  %v965_v25 = vld [vmem:[#allocation7 + $0x28] sm:$0xff] }
  0x82   :  { %1787 = vmatprep.subr.mxu1 %v606_v27  ;;  %1753 = vmatpush3.msra.mxu0 %v507_v26  ;;  %v981_v26 = vld [vmem:[#allocation7 + $0xa0] sm:$0xff] }
  0x83   :  { %1788 = vmatpush3.msra.mxu1 %v606_v27  ;;  %1754 = vmatprep.subr.mxu0 %v506_v28  ;;  %v964_v27 = vld [vmem:[#allocation7 + $0x20] sm:$0xff] }
  0x84   :  { %1789 = vmatprep.subr.mxu1 %v605_v29  ;;  %1755 = vmatpush3.msra.mxu0 %v506_v28  ;;  %v980_v28 = vld [vmem:[#allocation7 + $0x98] sm:$0xff] }
  0x85   :  { %1790 = vmatpush3.msra.mxu1 %v605_v29  ;;  %1756 = vmatprep.subr.mxu0 %v505_v30  ;;  %v963_v29 = vld [vmem:[#allocation7 + $0x18] sm:$0xff] }
  0x86   :  { %1791 = vmatprep.subr.mxu1 %v604_v31  ;;  %1757 = vmatpush3.msra.mxu0 %v505_v30  ;;  %v979_v30 = vld [vmem:[#allocation7 + $0x90] sm:$0xff] }
  0x87   :  { %1792 = vmatpush3.msra.mxu1 %v604_v31  ;;  %1758 = vmatprep.subr.mxu0 %v504_v32  ;;  %v962_v31 = vld [vmem:[#allocation7 + $0x10] sm:$0xff] }
  0x88   :  { %1793 = vmatprep.subr.mxu1 %v603_v33  ;;  %1759 = vmatpush3.msra.mxu0 %v504_v32  ;;  %v978_v32 = vld [vmem:[#allocation7 + $0x88] sm:$0xff] }
  0x89   :  { %1760 = vmatprep.mubr.f32.mxu0 %v2161_v34  ;;  %1794 = vmatpush3.msra.mxu1 %v603_v33  ;;  %v961_v33 = vld [vmem:[#allocation7 + $0x8] sm:$0xff] }
  0x8a   :  { %1795 = vmatprep.mubr.f32.mxu1 %v2161_v34  ;;  %1761 = vmatmul.mubr.f32.vlgmr.msra.gmra.mxu0 %v2166_v35 }
  0x8b   :  { %1796 = vmatmul.mubr.f32.vlgmr.msra.gmra.mxu1 %v2166_v35  ;;  %1798 = vmatprep.subr.mxu0 %v718_v36 }
  0x8c   :  { %1833 = vmatprep.subr.mxu1 %v818_v37  ;;  %1799 = vmatpush3.msra.mxu0 %v718_v36  ;;  %v2176_v36 = vld [vmem:[#allocation7 + $0x178] sm:$0xff] }
  0x8d   :  { %1834 = vmatpush3.msra.mxu1 %v818_v37  ;;  %1800 = vmatprep.subr.mxu0 %v717_v38  ;;  %v2178_v37 = vld [vmem:[#allocation7 + $0x1f8] sm:$0xff] }
  0x8e   :  { %1835 = vmatprep.subr.mxu1 %v817_v39  ;;  %1801 = vmatpush3.msra.mxu0 %v717_v38 }
  0x8f   :  { %1836 = vmatpush3.msra.mxu1 %v817_v39  ;;  %1802 = vmatprep.subr.mxu0 %v716_v40 }
  0x90   :  { %1837 = vmatprep.subr.mxu1 %v816_v41  ;;  %1803 = vmatpush3.msra.mxu0 %v716_v40 }
  0x91   :  { %1838 = vmatpush3.msra.mxu1 %v816_v41  ;;  %1804 = vmatprep.subr.mxu0 %v715_v42 }
  0x92   :  { %1839 = vmatprep.subr.mxu1 %v815_v43  ;;  %1805 = vmatpush3.msra.mxu0 %v715_v42  ;;  %v1357_v42 = vld [vmem:[%s2271_s6] ss:$0 sm:$0xff] }
  0x93   :  { %1840 = vmatpush3.msra.mxu1 %v815_v43  ;;  %1806 = vmatprep.subr.mxu0 %v714_v44  ;;  %v1359_v43 = vld [vmem:[%s2271_s6 + $0x1] ss:$0 sm:$0xff] }
  0x94   :  { %1841 = vmatprep.subr.mxu1 %v814_v45  ;;  %1807 = vmatpush3.msra.mxu0 %v714_v44 }
  0x95   :  { %1842 = vmatpush3.msra.mxu1 %v814_v45  ;;  %1808 = vmatprep.subr.mxu0 %v713_v46  ;;  %v1361_v45 = vld [vmem:[%s2271_s6 + $0x2] ss:$0 sm:$0xff] }
  0x96   :  { %1843 = vmatprep.subr.mxu1 %v813_v47  ;;  %1809 = vmatpush3.msra.mxu0 %v713_v46 }
  0x97   :  { %1844 = vmatpush3.msra.mxu1 %v813_v47  ;;  %1810 = vmatprep.subr.mxu0 %v712_v48 }
  0x98   :  { %1845 = vmatprep.subr.mxu1 %v812_v49  ;;  %1811 = vmatpush3.msra.mxu0 %v712_v48 }
  0x99   :  { %1846 = vmatpush3.msra.mxu1 %v812_v49  ;;  %1812 = vmatprep.subr.mxu0 %v711_v50 }
  0x9a   :  { %1847 = vmatprep.subr.mxu1 %v811_v51  ;;  %1813 = vmatpush3.msra.mxu0 %v711_v50 }
  0x9b   :  { %1848 = vmatpush3.msra.mxu1 %v811_v51  ;;  %1814 = vmatprep.subr.mxu0 %v710_v52 }
  0x9c   :  { %1849 = vmatprep.subr.mxu1 %v810_v53  ;;  %1815 = vmatpush3.msra.mxu0 %v710_v52 }
  0x9d   :  { %1850 = vmatpush3.msra.mxu1 %v810_v53  ;;  %1816 = vmatprep.subr.mxu0 %v709_v54  ;;  %v1363_v53 = vld [vmem:[%s2271_s6 + $0x3] ss:$0 sm:$0xff] }
  0x9e   :  { %1851 = vmatprep.subr.mxu1 %v809_v55  ;;  %1817 = vmatpush3.msra.mxu0 %v709_v54 }
  0x9f   :  { %1852 = vmatpush3.msra.mxu1 %v809_v55  ;;  %1818 = vmatprep.subr.mxu0 %v708_v56 }
  0xa0   :  { %1853 = vmatprep.subr.mxu1 %v808_v57  ;;  %1819 = vmatpush3.msra.mxu0 %v708_v56 }
  0xa1   :  { %1854 = vmatpush3.msra.mxu1 %v808_v57  ;;  %1820 = vmatprep.subr.mxu0 %v707_v58 }
  0xa2   :  { %1855 = vmatprep.subr.mxu1 %v807_v59  ;;  %1821 = vmatpush3.msra.mxu0 %v707_v58 }
  0xa3   :  { %1856 = vmatpush3.msra.mxu1 %v807_v59  ;;  %1822 = vmatprep.subr.mxu0 %v706_v60 }
  0xa4   :  { %1857 = vmatprep.subr.mxu1 %v806_v61  ;;  %1823 = vmatpush3.msra.mxu0 %v706_v60 }
  0xa5   :  { %1858 = vmatpush3.msra.mxu1 %v806_v61  ;;  %1824 = vmatprep.subr.mxu0 %v705_v62 }
  0xa6   :  { %1859 = vmatprep.subr.mxu1 %v805_v63  ;;  %1825 = vmatpush3.msra.mxu0 %v705_v62 }
  0xa7   :  { %1860 = vmatpush3.msra.mxu1 %v805_v63  ;;  %1826 = vmatprep.subr.mxu0 %v704_v0 }
  0xa8   :  { %1861 = vmatprep.subr.mxu1 %v804_v1  ;;  %1827 = vmatpush3.msra.mxu0 %v704_v0 }
  0xa9   :  { %1862 = vmatpush3.msra.mxu1 %v804_v1  ;;  %1828 = vmatprep.subr.mxu0 %v703_v2 }
  0xaa   :  { %1863 = vmatprep.subr.mxu1 %v803_v3  ;;  %1829 = vmatpush3.msra.mxu0 %v703_v2 }
  0xab   :  { %1830 = vmatprep.mubr.f32.mxu0 %v2161_v34  ;;  %1864 = vmatpush3.msra.mxu1 %v803_v3 }
  0xac   :  { %1865 = vmatprep.mubr.f32.mxu1 %v2161_v34  ;;  %1831 = vmatmul.mubr.f32.vlgmr.msra.gmra.mxu0 %v2166_v35  ;;  %v977_v34 = vld [vmem:[#allocation7 + $0x80] sm:$0xff] }
  0xad   :  { %1866 = vmatmul.mubr.f32.vlgmr.msra.gmra.mxu1 %v2166_v35  ;;  %1868 = vmatprep.subr.mxu0 %v992_v4  ;;  %v960_v35 = vld [vmem:[#allocation7] sm:$0xff] }
  0xae   :  { %1903 = vmatprep.subr.mxu1 %v975_v5  ;;  %1869 = vmatpush3.msra.mxu0 %v992_v4 }
  0xaf   :  { %1904 = vmatpush3.msra.mxu1 %v975_v5  ;;  %1870 = vmatprep.subr.mxu0 %v991_v6 }
  0xb0   :  { %1905 = vmatprep.subr.mxu1 %v974_v7  ;;  %1871 = vmatpush3.msra.mxu0 %v991_v6 }
  0xb1   :  { %1906 = vmatpush3.msra.mxu1 %v974_v7  ;;  %1872 = vmatprep.subr.mxu0 %v990_v8 }
  0xb2   :  { %1907 = vmatprep.subr.mxu1 %v973_v9  ;;  %1873 = vmatpush3.msra.mxu0 %v990_v8 }
  0xb3   :  { %1908 = vmatpush3.msra.mxu1 %v973_v9  ;;  %1874 = vmatprep.subr.mxu0 %v989_v10 }
  0xb4   :  { %1909 = vmatprep.subr.mxu1 %v972_v11  ;;  %1875 = vmatpush3.msra.mxu0 %v989_v10 }
  0xb5   :  { %1910 = vmatpush3.msra.mxu1 %v972_v11  ;;  %1876 = vmatprep.subr.mxu0 %v988_v12 }
  0xb6   :  { %1911 = vmatprep.subr.mxu1 %v971_v13  ;;  %1877 = vmatpush3.msra.mxu0 %v988_v12  ;;  %v1364_v12 = vld [vmem:[%s2270_s5] ss:$0 sm:$0xff] }
  0xb7   :  { %1912 = vmatpush3.msra.mxu1 %v971_v13  ;;  %1878 = vmatprep.subr.mxu0 %v987_v14  ;;  %v1366_v13 = vld [vmem:[%s2270_s5 + $0x1] ss:$0 sm:$0xff] }
  0xb8   :  { %1913 = vmatprep.subr.mxu1 %v970_v15  ;;  %1879 = vmatpush3.msra.mxu0 %v987_v14 }
  0xb9   :  { %1914 = vmatpush3.msra.mxu1 %v970_v15  ;;  %1880 = vmatprep.subr.mxu0 %v986_v16 }
  0xba   :  { %1915 = vmatprep.subr.mxu1 %v969_v17  ;;  %1881 = vmatpush3.msra.mxu0 %v986_v16 }
  0xbb   :  { %1916 = vmatpush3.msra.mxu1 %v969_v17  ;;  %1882 = vmatprep.subr.mxu0 %v985_v18 }
  0xbc   :  { %1917 = vmatprep.subr.mxu1 %v968_v19  ;;  %1883 = vmatpush3.msra.mxu0 %v985_v18 }
  0xbd   :  { %1918 = vmatpush3.msra.mxu1 %v968_v19  ;;  %1884 = vmatprep.subr.mxu0 %v984_v20 }
  0xbe   :  { %1919 = vmatprep.subr.mxu1 %v967_v21  ;;  %1885 = vmatpush3.msra.mxu0 %v984_v20 }
  0xbf   :  { %1920 = vmatpush3.msra.mxu1 %v967_v21  ;;  %1886 = vmatprep.subr.mxu0 %v983_v22 }
  0xc0   :  { %1921 = vmatprep.subr.mxu1 %v966_v23  ;;  %1887 = vmatpush3.msra.mxu0 %v983_v22 }
  0xc1   :  { %1922 = vmatpush3.msra.mxu1 %v966_v23  ;;  %1888 = vmatprep.subr.mxu0 %v982_v24  ;;  %v1368_v23 = vld [vmem:[%s2270_s5 + $0x2] ss:$0 sm:$0xff] }
  0xc2   :  { %1923 = vmatprep.subr.mxu1 %v965_v25  ;;  %1889 = vmatpush3.msra.mxu0 %v982_v24 }
  0xc3   :  { %1924 = vmatpush3.msra.mxu1 %v965_v25  ;;  %1890 = vmatprep.subr.mxu0 %v981_v26 }
  0xc4   :  { %1925 = vmatprep.subr.mxu1 %v964_v27  ;;  %1891 = vmatpush3.msra.mxu0 %v981_v26 }
  0xc5   :  { %1926 = vmatpush3.msra.mxu1 %v964_v27  ;;  %1892 = vmatprep.subr.mxu0 %v980_v28 }
  0xc6   :  { %1927 = vmatprep.subr.mxu1 %v963_v29  ;;  %1893 = vmatpush3.msra.mxu0 %v980_v28 }
  0xc7   :  { %1928 = vmatpush3.msra.mxu1 %v963_v29  ;;  %1894 = vmatprep.subr.mxu0 %v979_v30 }
  0xc8   :  { %1929 = vmatprep.subr.mxu1 %v962_v31  ;;  %1895 = vmatpush3.msra.mxu0 %v979_v30 }
  0xc9   :  { %1930 = vmatpush3.msra.mxu1 %v962_v31  ;;  %1896 = vmatprep.subr.mxu0 %v978_v32 }
  0xca   :  { %1931 = vmatprep.subr.mxu1 %v961_v33  ;;  %1897 = vmatpush3.msra.mxu0 %v978_v32 }
  0xcb   :  { %1932 = vmatpush3.msra.mxu1 %v961_v33  ;;  %1898 = vmatprep.subr.mxu0 %v977_v34 }
  0xcc   :  { %1933 = vmatprep.subr.mxu1 %v960_v35  ;;  %1899 = vmatpush3.msra.mxu0 %v977_v34 }
  0xcd   :  { %1934 = vmatpush3.msra.mxu1 %v960_v35  ;;  %1938 = vmatprep.subr.mxu0 %v2176_v36 }
  0xce   :  { %1973 = vmatprep.subr.mxu1 %v2178_v37 }
 0x106   :  { %v1622_v38 = vpop.f32.mrf.mxu0 }
 0x107   :  { %v1657_v39 = vpop.f32.mrf.mxu1  ;;  %v175_v46 = vadd.f32 %v1622_v38, %v1357_v42 }
 0x108   :  { %v169_v40 = vpop.f32.mrf.mxu0  ;;  %v275_v47 = vadd.f32 %v1657_v39, %v1359_v43 }
 0x109   :  { %v269_v44 = vpop.f32.mrf.mxu1  ;;  %v170_v50 = vadd.f32 %v1357_v42, %v169_v40  ;;  %v479_v55 = vmul.f32 %v175_v46, %v175_v46 }
 0x10a   :  { %v270_v51 = vadd.f32 %v1359_v43, %v269_v44  ;;  %v481_v56 = vmul.f32 %v275_v47, %v275_v47 }
 0x10b   :  { %v478_v58 = vmul.f32 %v170_v50, %v170_v50 }
 0x10c   :  { %v480_v59 = vmul.f32 %v270_v51, %v270_v51  ;;  %v483_v0 = vadd.f32 %v481_v56, %v479_v55 }
 0x10e   :  { %v482_v1 = vadd.f32 %v480_v59, %v478_v58 }
 0x128   :  { %v1692_v41 = vpop.f32.mrf.mxu0 }
 0x129   :  { %v375_v52 = vadd.f32 %v1692_v41, %v1361_v45 }
 0x12a   :  { %v1727_v48 = vpop.f32.mrf.mxu1  ;;  %v369_v49 = vpop.f32.mrf.mxu0 }
 0x12b   :  { %v370_v54 = vadd.f32 %v1361_v45, %v369_v49  ;;  %v485_v60 = vmul.f32 %v375_v52, %v375_v52  ;;  %v475_v61 = vadd.f32 %v1727_v48, %v1363_v53 }
 0x12c   :  { %v469_v57 = vpop.f32.mrf.mxu1 }
 0x12d   :  { %v484_v62 = vmul.f32 %v370_v54, %v370_v54  ;;  %v470_v63 = vadd.f32 %v1363_v53, %v469_v57  ;;  %v487_v2 = vadd.f32 %v485_v60, %v483_v0  ;;  %v489_v3 = vmul.f32 %v475_v61, %v475_v61 }
 0x12f   :  { %v486_v4 = vadd.f32 %v484_v62, %v482_v1  ;;  %v488_v5 = vmul.f32 %v470_v63, %v470_v63  ;;  %v491_v6 = vadd.f32 %v489_v3, %v487_v2 }
 0x131   :  { %v490_v7 = vadd.f32 %v488_v5, %v486_v4  ;;  %v493_v8 = vadd.f32 1e-12, %v491_v6 }
 0x133   :  { %v492_v9 = vadd.f32 1e-12, %v490_v7  ;;  %2013 = vrsqrt.f32 %v493_v8 }
 0x135   :  { %2015 = vrsqrt.f32 %v492_v9 }
 0x140   :  { %v2014_v14 = vpop.eup %2013 }
 0x141   :  { %v2204_v20 = vmul.f32 %v2014_v14, %v175_v46  ;;  %v2209_v24 = vmul.f32 %v2014_v14, %v475_v61  ;;  %v2211_v26 = vmul.f32 %v2014_v14, %v275_v47  ;;  %v2213_v27 = vmul.f32 %v2014_v14, %v375_v52 }
 0x142   :  { %v2016_v17 = vpop.eup %2015 }
 0x143   :  { %v502_v25 = vmul.f32 %v2016_v17, %v470_v63  ;;  %v496_v29 = vmul.f32 %v2016_v17, %v170_v50  ;;  %v498_v30 = vmul.f32 %v2016_v17, %v270_v51  ;;  %v500_v31 = vmul.f32 %v2016_v17, %v370_v54  ;;  %v1370_v50 = vld [vmem:[%s2270_s5 + $0x3] ss:$0 sm:$0xff]  ;;  %v1158_v17 = vld [vmem:[#allocation7 + $0x170] sm:$0xff] }
 0x14a   :  { %v1762_v10 = vpop.f32.mrf.mxu0 }
 0x14b   :  { %v1797_v11 = vpop.f32.mrf.mxu1  ;;  %v2200_v18 = vadd.f32 %v1762_v10, %v1364_v12 }
 0x14c   :  { %v593_v15 = vpop.f32.mrf.mxu0  ;;  %v2202_v19 = vadd.f32 %v1797_v11, %v1366_v13 }
 0x14d   :  { %v693_v16 = vpop.f32.mrf.mxu1  ;;  %v594_v21 = vadd.f32 %v1364_v12, %v593_v15  ;;  %v903_v28 = vmul.f32 %v2200_v18, %v2204_v20  ;;  %v917_v34 = vmul.f32 %v2200_v18, %v2211_v26 }
 0x14e   :  { %v694_v22 = vadd.f32 %v1366_v13, %v693_v16  ;;  %v905_v35 = vmul.f32 %v2202_v19, %v2211_v26  ;;  %v919_v38 = vmul.f32 %v2202_v19, %v2204_v20 }
 0x14f   :  { %v902_v40 = vmul.f32 %v594_v21, %v496_v29  ;;  %v916_v41 = vmul.f32 %v594_v21, %v498_v30  ;;  %v930_v46 = vmul.f32 %v594_v21, %v500_v31  ;;  %v944_v47 = vmul.f32 %v594_v21, %v502_v25 }
 0x150   :  { %v904_v42 = vmul.f32 %v694_v22, %v498_v30  ;;  %v918_v43 = vmul.f32 %v694_v22, %v496_v29  ;;  %v932_v48 = vmul.f32 %v694_v22, %v502_v25  ;;  %v946_v49 = vmul.f32 %v694_v22, %v500_v31 }
 0x151   :  { %v907_v53 = vsub.f32 %v903_v28, %v905_v35  ;;  %v921_v56 = vadd.f32 %v919_v38, %v917_v34  ;;  %v1157_v28 = vld [vmem:[#allocation7 + $0x168] sm:$0xff]  ;;  %v1152_v38 = vld [vmem:[#allocation7 + $0x140] sm:$0xff] }
 0x152   :  { %v920_v58 = vadd.f32 %v918_v43, %v916_v41  ;;  %v906_v59 = vsub.f32 %v902_v40, %v904_v42  ;;  %v934_v62 = vsub.f32 %v930_v46, %v932_v48  ;;  %v948_v63 = vadd.f32 %v946_v49, %v944_v47  ;;  %v1153_v34 = vld [vmem:[#allocation7 + $0x148] sm:$0xff]  ;;  %v1246_v40 = vld [vmem:[#allocation7 + $0x1c0] sm:$0xff]  ;;  %v1151_v41 = vld [vmem:[#allocation7 + $0x138] sm:$0xff] }
 0x153   :  { %v1247_v35 = vld [vmem:[#allocation7 + $0x1c8] sm:$0xff]  ;;  %v1245_v42 = vld [vmem:[#allocation7 + $0x1b8] sm:$0xff]  ;;  %v1150_v43 = vld [vmem:[#allocation7 + $0x130] sm:$0xff]  ;;  %v931_v47 = vmul.f32 %v2200_v18, %v2213_v27 }
 0x154   :  { %v1243_v46 = vld [vmem:[#allocation7 + $0x1a8] sm:$0xff]  ;;  %v1148_v48 = vld [vmem:[#allocation7 + $0x120] sm:$0xff] }
 0x155   :  { %v1242_v49 = vld [vmem:[#allocation7 + $0x1a0] sm:$0xff] }
 0x16c   :  { %v1832_v32 = vpop.f32.mrf.mxu0 }
 0x16d   :  { %v1867_v33 = vpop.f32.mrf.mxu1  ;;  %v2223_v39 = vadd.f32 %v1832_v32, %v1368_v23  ;;  %v1250_v32 = vld [vmem:[#allocation7 + $0x1e0] sm:$0xff] }
 0x16e   :  { %v793_v44 = vpop.f32.mrf.mxu0  ;;  %v2232_v57 = vadd.f32 %v1867_v33, %v1370_v50  ;;  %v1249_v33 = vld [vmem:[#allocation7 + $0x1d8] sm:$0xff] }
 0x16f   :  { %v893_v45 = vpop.f32.mrf.mxu1  ;;  %v909_v51 = vmul.f32 %v2223_v39, %v2213_v27  ;;  %v923_v52 = vmul.f32 %v2223_v39, %v2209_v24  ;;  %v794_v54 = vadd.f32 %v1368_v23, %v793_v44  ;;  %v1252_v23 = vld [vmem:[#allocation7 + $0x1f0] sm:$0xff] }
 0x170   :  { %v894_v55 = vadd.f32 %v1370_v50, %v893_v45  ;;  %v913_v8 = vmul.f32 %v2232_v57, %v2209_v24  ;;  %v927_v9 = vmul.f32 %v2232_v57, %v2213_v27  ;;  %v1244_v44 = vld [vmem:[#allocation7 + $0x1b0] sm:$0xff]  ;;  %v1149_v45 = vld [vmem:[#allocation7 + $0x128] sm:$0xff]  ;;  %v945_v50 = vmul.f32 %v2200_v18, %v2209_v24 }
 0x171   :  { %v922_v60 = vmul.f32 %v794_v54, %v502_v25  ;;  %v908_v61 = vmul.f32 %v794_v54, %v500_v31  ;;  %v925_v1 = vadd.f32 %v923_v52, %v921_v56  ;;  %v911_v2 = vsub.f32 %v907_v53, %v909_v51  ;;  %v1147_v53 = vld [vmem:[#allocation7 + $0x118] sm:$0xff]  ;;  %v1146_v18 = vld [vmem:[#allocation7 + $0x110] sm:$0xff] }
 0x172   :  { %v926_v0 = vmul.f32 %v894_v55, %v500_v31  ;;  %v936_v3 = vmul.f32 %v794_v54, %v496_v29  ;;  %v912_v6 = vmul.f32 %v894_v55, %v502_v25  ;;  %v950_v7 = vmul.f32 %v794_v54, %v498_v30  ;;  %v1251_v31 = vld [vmem:[#allocation7 + $0x1e8] sm:$0xff]  ;;  %v1241_v54 = vld [vmem:[#allocation7 + $0x198] sm:$0xff] }
 0x173   :  { %v924_v4 = vadd.f32 %v922_v60, %v920_v58  ;;  %v910_v5 = vsub.f32 %v906_v59, %v908_v61  ;;  %v929_v14 = vsub.f32 %v925_v1, %v927_v9  ;;  %v915_v15 = vsub.f32 %v911_v2, %v913_v8  ;;  %v1239_v59 = vld [vmem:[#allocation7 + $0x188] sm:$0xff]  ;;  %v1371_v9 = vld [vmem:[%s2272_s7] ss:$0 sm:$0xff] }
 0x174   :  { %v938_v10 = vadd.f32 %v936_v3, %v934_v62  ;;  %v952_v13 = vsub.f32 %v948_v63, %v950_v7  ;;  %v940_v16 = vmul.f32 %v894_v55, %v498_v30  ;;  %v954_v21 = vmul.f32 %v894_v55, %v496_v29  ;;  %v1156_v30 = vld [vmem:[#allocation7 + $0x160] sm:$0xff]  ;;  %v1155_v29 = vld [vmem:[#allocation7 + $0x158] sm:$0xff] }
 0x175   :  { %v928_v11 = vsub.f32 %v924_v4, %v926_v0  ;;  %v914_v12 = vsub.f32 %v910_v5, %v912_v6  ;;  %v933_v51 = vmul.f32 %v2202_v19, %v2209_v24  ;;  %v947_v52 = vmul.f32 %v2202_v19, %v2213_v27  ;;  %v1240_v24 = vld [vmem:[#allocation7 + $0x190] sm:$0xff]  ;;  %v1145_v27 = vld [vmem:[#allocation7 + $0x108] sm:$0xff]  ;;  %v1238_v62 = vld [vmem:[#allocation7 + $0x180] sm:$0xff] }
 0x176   :  { %v942_v22 = vadd.f32 %v940_v16, %v938_v10  ;;  %v956_v25 = vadd.f32 %v954_v21, %v952_v13  ;;  %v937_v55 = vmul.f32 %v2223_v39, %v2204_v20  ;;  %v951_v56 = vmul.f32 %v2223_v39, %v2211_v26  ;;  %v1144_v39 = vld [vmem:[#allocation7 + $0x100] sm:$0xff] }
 0x177   :  { %1900 = vmatprep.mubr.f32.mxu0 %v928_v11  ;;  %1935 = vmatprep.mubr.f32.mxu1 %v914_v12  ;;  %v935_v58 = vsub.f32 %v931_v47, %v933_v51  ;;  %v949_v19 = vadd.f32 %v947_v52, %v945_v50  ;;  %v941_v63 = vmul.f32 %v2232_v57, %v2211_v26 }
 0x178   :  { %1901 = vmatmul.mubr.f32.vlgmr.msra.gmra.mxu0 %v929_v14  ;;  %1936 = vmatmul.mubr.f32.vlgmr.msra.gmra.mxu1 %v915_v15  ;;  %v955_v0 = vmul.f32 %v2232_v57, %v2204_v20 }
 0x179   :  { %1939 = vmatpush3.msra.mxu0 %v2176_v36  ;;  %1974 = vmatpush3.msra.mxu1 %v2178_v37  ;;  %v1154_v36 = vld [vmem:[#allocation7 + $0x150] sm:$0xff]  ;;  %v939_v60 = vadd.f32 %v937_v55, %v935_v58  ;;  %v953_v61 = vsub.f32 %v949_v19, %v951_v56 }
 0x17a   :  { %1940 = vmatprep.subr.mxu0 %v1158_v17  ;;  %1970 = vmatprep.mubr.f32.mxu0 %v942_v22  ;;  %v1248_v37 = vld [vmem:[#allocation7 + $0x1d0] sm:$0xff] }
 0x17b   :  { %1975 = vmatprep.subr.mxu1 %v1252_v23  ;;  %2005 = vmatprep.mubr.f32.mxu1 %v956_v25  ;;  %v943_v1 = vadd.f32 %v941_v63, %v939_v60  ;;  %v957_v2 = vadd.f32 %v955_v0, %v953_v61 }
 0x17c   :  { %1941 = vmatpush3.msra.mxu0 %v1158_v17  ;;  %1976 = vmatpush3.msra.mxu1 %v1252_v23 }
 0x17d   :  { %1942 = vmatprep.subr.mxu0 %v1157_v28  ;;  %1977 = vmatprep.subr.mxu1 %v1251_v31 }
 0x17e   :  { %1943 = vmatpush3.msra.mxu0 %v1157_v28  ;;  %1978 = vmatpush3.msra.mxu1 %v1251_v31 }
 0x17f   :  { %1944 = vmatprep.subr.mxu0 %v1156_v30  ;;  %1979 = vmatprep.subr.mxu1 %v1250_v32 }
 0x180   :  { %1945 = vmatpush3.msra.mxu0 %v1156_v30  ;;  %1980 = vmatpush3.msra.mxu1 %v1250_v32 }
 0x181   :  { %1946 = vmatprep.subr.mxu0 %v1155_v29  ;;  %1981 = vmatprep.subr.mxu1 %v1249_v33 }
 0x182   :  { %1947 = vmatpush3.msra.mxu0 %v1155_v29  ;;  %1982 = vmatpush3.msra.mxu1 %v1249_v33 }
 0x183   :  { %1948 = vmatprep.subr.mxu0 %v1154_v36  ;;  %1983 = vmatprep.subr.mxu1 %v1248_v37 }
 0x184   :  { %1949 = vmatpush3.msra.mxu0 %v1154_v36  ;;  %1984 = vmatpush3.msra.mxu1 %v1248_v37 }
 0x185   :  { %1950 = vmatprep.subr.mxu0 %v1153_v34  ;;  %1985 = vmatprep.subr.mxu1 %v1247_v35 }
 0x186   :  { %1951 = vmatpush3.msra.mxu0 %v1153_v34  ;;  %1986 = vmatpush3.msra.mxu1 %v1247_v35 }
 0x187   :  { %1952 = vmatprep.subr.mxu0 %v1152_v38  ;;  %1987 = vmatprep.subr.mxu1 %v1246_v40 }
 0x188   :  { %1953 = vmatpush3.msra.mxu0 %v1152_v38  ;;  %1988 = vmatpush3.msra.mxu1 %v1246_v40 }
 0x189   :  { %1954 = vmatprep.subr.mxu0 %v1151_v41  ;;  %1989 = vmatprep.subr.mxu1 %v1245_v42 }
 0x18a   :  { %1955 = vmatpush3.msra.mxu0 %v1151_v41  ;;  %1990 = vmatpush3.msra.mxu1 %v1245_v42 }
 0x18b   :  { %1956 = vmatprep.subr.mxu0 %v1150_v43  ;;  %1991 = vmatprep.subr.mxu1 %v1244_v44 }
 0x18c   :  { %1957 = vmatpush3.msra.mxu0 %v1150_v43  ;;  %1992 = vmatpush3.msra.mxu1 %v1244_v44 }
 0x18d   :  { %1958 = vmatprep.subr.mxu0 %v1149_v45  ;;  %1993 = vmatprep.subr.mxu1 %v1243_v46 }
 0x18e   :  { %1959 = vmatpush3.msra.mxu0 %v1149_v45  ;;  %1994 = vmatpush3.msra.mxu1 %v1243_v46 }
 0x18f   :  { %1960 = vmatprep.subr.mxu0 %v1148_v48  ;;  %1995 = vmatprep.subr.mxu1 %v1242_v49 }
 0x190   :  { %1961 = vmatpush3.msra.mxu0 %v1148_v48  ;;  %1996 = vmatpush3.msra.mxu1 %v1242_v49 }
 0x191   :  { %1962 = vmatprep.subr.mxu0 %v1147_v53  ;;  %1997 = vmatprep.subr.mxu1 %v1241_v54 }
 0x192   :  { %1963 = vmatpush3.msra.mxu0 %v1147_v53  ;;  %1998 = vmatpush3.msra.mxu1 %v1241_v54 }
 0x193   :  { %1964 = vmatprep.subr.mxu0 %v1146_v18  ;;  %1999 = vmatprep.subr.mxu1 %v1240_v24 }
 0x194   :  { %1965 = vmatpush3.msra.mxu0 %v1146_v18  ;;  %2000 = vmatpush3.msra.mxu1 %v1240_v24 }
 0x195   :  { %1966 = vmatprep.subr.mxu0 %v1145_v27  ;;  %2001 = vmatprep.subr.mxu1 %v1239_v59 }
 0x196   :  { %1967 = vmatpush3.msra.mxu0 %v1145_v27  ;;  %2002 = vmatpush3.msra.mxu1 %v1239_v59 }
 0x197   :  { %1968 = vmatprep.subr.mxu0 %v1144_v39  ;;  %2003 = vmatprep.subr.mxu1 %v1238_v62 }
 0x198   :  { %1969 = vmatpush3.msra.mxu0 %v1144_v39  ;;  %2004 = vmatpush3.msra.mxu1 %v1238_v62 }
 0x199   :  { %1971 = vmatmul.mubr.f32.vlgmr.msra.gmra.mxu0 %v943_v1  ;;  %2006 = vmatmul.mubr.f32.vlgmr.msra.gmra.mxu1 %v957_v2 }
 0x238   :  { %v1902_v3 = vpop.f32.mrf.mxu0  ;;  %v1937_v4 = vpop.f32.mrf.mxu1 }
 0x239   :  { %v1140_v26 = vadd.f32 %v1937_v4, %v1902_v3 }
 0x23a   :  { %v1059_v5 = vpop.f32.mrf.mxu0  ;;  %v1134_v6 = vpop.f32.mrf.mxu1 }
 0x23b   :  { %v1135_v20 = vadd.f32 %v1134_v6, %v1059_v5 }
 0x259   :  { %v1972_v7 = vpop.f32.mrf.mxu0  ;;  %v2007_v8 = vpop.f32.mrf.mxu1 }
 0x25a   :  { %v1236_v57 = vadd.f32 %v1972_v7, %v1140_v26 }
 0x25b   :  { %v1226_v10 = vpop.f32.mrf.mxu0  ;;  %v1320_v13 = vpop.f32.mrf.mxu1 }
 0x25c   :  { %v1330_v11 = vadd.f32 %v2007_v8, %v1236_v57  ;;  %v1235_v12 = vadd.f32 %v1226_v10, %v1135_v20 }
 0x25e   :  { %v1348_v14 = vadd.f32 %v1371_v9, %v1330_v11  ;;  %v1329_v15 = vadd.f32 %v1320_v13, %v1235_v12 }
 0x260   :  { %1350 = vst [vmem:[%s2273_s8 + $0x8] sm:$0xff] %v1348_v14  ;;  %v1347_v16 = vadd.f32 %v1371_v9, %v1329_v15 }
 0x262   :  { %1349 = vst [vmem:[%s2273_s8] sm:$0xff] %v1347_v16 }
 0x263   :  { %1355 = vsyncpa [#allocation4], 1 }
 0x264   :  { %1356 = vsyncpa [#allocation6], 1 }

</bundles_post_ra>
